<compile_context>
chip_gen: v7x
topology: tpu7x:2x2x1
jax: 0.10.0
libtpu: 0.0.40
codegen_flags: <defaults>
</compile_context>

<pallas_src>
import functools
import math

import jax
import jax.numpy as jnp
from jax.experimental import pallas as pl
from jax.experimental.pallas import tpu as pltpu


def _round_up(n, m):
    return ((n + m - 1) // m) * m


# ----------------------------------------------------------------------------
# Shared pieces of the model definition (used by kernel path and reference)
# ----------------------------------------------------------------------------
def _positional_encoding(seq_len, d_model):
    """pe[p, j] = sin(p / 10000**(2j/d)) for even j, cos(...) for odd j."""
    pos = jnp.arange(seq_len, dtype=jnp.float32)[:, None]
    j = jnp.arange(d_model, dtype=jnp.float32)[None, :]
    ang = pos / jnp.power(10000.0, 2.0 * j / d_model)
    even = (jnp.arange(d_model) % 2 == 0)[None, :]
    return jnp.where(even, jnp.sin(ang), jnp.cos(ang)).astype(jnp.float32)


def _attn_bias(mask, B, S, T, causal):
    """Additive (B, T, T) attention bias from src_key_padding_mask (+causal)."""
    mask = mask.astype(bool)
    if mask.shape[1] == S:          # mask over the S strokes: user token unmasked
        mask = jnp.concatenate([jnp.zeros((B, 1), bool), mask], axis=1)
    assert mask.shape == (B, T)
    kp = jnp.where(mask, -1e30, 0.0).astype(jnp.float32)        # (B, T)
    bias = jnp.broadcast_to(kp[:, None, :], (B, T, T))
    if causal:
        cb = jnp.where(jnp.arange(T)[:, None] >= jnp.arange(T)[None, :],
                       0.0, -1e30).astype(jnp.float32)
        bias = bias + cb[None]
    return bias


# ----------------------------------------------------------------------------
# The fused Pallas kernel
# ----------------------------------------------------------------------------
def _stroke_net_kernel(x0_ref, pe_ref, m1w_ref, m1b_ref, m2w_ref, m2b_ref,
                       bias_ref, ln1g_ref, ln1b_ref, qkvw_ref, qkvb_ref,
                       ow_ref, ob_ref, ln2g_ref, ln2b_ref,
                       f1w_ref, f1b_ref, f2w_ref, f2b_ref, hw_ref,
                       out_ref, x_scr,
                       *, d_real, nhead, head_dim, hd_pad, sqrt_d):
    f32 = jnp.float32
    layer = pl.program_id(1)
    t, dp = x_scr.shape

    # lane mask for the real (unpadded) model dim; hoisted, used by both LNs
    lane = jax.lax.broadcasted_iota(jnp.int32, (t, dp), 1)
    lane_mask = (lane < d_real).astype(f32)

    def layer_norm(x, g, b):
        mean = jnp.sum(x, axis=-1, keepdims=True) * (1.0 / d_real)
        cen = (x - mean) * lane_mask                      # padded lanes -> 0
        var = jnp.sum(cen * cen, axis=-1, keepdims=True) * (1.0 / d_real)
        return cen * jax.lax.rsqrt(var + 1e-5) * g + b    # padded g/b are 0

    # ---- prologue (layer step 0): input MLP + positional encoding ----------
    @pl.when(layer == 0)
    def _():
        h = jnp.dot(x0_ref[0], m1w_ref[...], preferred_element_type=f32) + m1b_ref[...]
        h = jnp.maximum(h, 0.0)
        h = jnp.dot(h, m2w_ref[...], preferred_element_type=f32) + m2b_ref[...]
        h = jnp.maximum(h, 0.0)
        x_scr[...] = h * sqrt_d + pe_ref[...]

    x = x_scr[...]                                        # (T, Dp), pads are 0

    # ---- self-attention sub-block (pre-norm) --------------------------------
    h = layer_norm(x, ln1g_ref[0], ln1b_ref[0])
    qkv = jnp.dot(h, qkvw_ref[0], preferred_element_type=f32) + qkvb_ref[0]
    bias = bias_ref[0]                                    # (T, T) additive bias
    scale = 1.0 / math.sqrt(head_dim)
    heads = []
    for hi in range(nhead):
        c = hi * hd_pad
        q = qkv[:, c:c + hd_pad]                          # (T, hd_pad), pads 0
        k = qkv[:, dp + c:dp + c + hd_pad]
        v = qkv[:, 2 * dp + c:2 * dp + c + hd_pad]
        s = jax.lax.dot_general(q, k, (((1,), (1,)), ((), ())),
                                preferred_element_type=f32) * scale + bias
        s = s - jnp.max(s, axis=-1, keepdims=True)
        p = jnp.exp(s)
        p = p * pl.reciprocal(jnp.sum(p, axis=-1, keepdims=True), approx=True)
        heads.append(jnp.dot(p, v, preferred_element_type=f32))
    attn = jnp.concatenate(heads, axis=-1)                # (T, Dp) head layout
    attn = jnp.dot(attn, ow_ref[0], preferred_element_type=f32) + ob_ref[0]
    x = x + attn                                          # dropout1 = identity

    # ---- feed-forward sub-block ---------------------------------------------
    h2 = layer_norm(x, ln2g_ref[0], ln2b_ref[0])
    ff = jnp.dot(h2, f1w_ref[0], preferred_element_type=f32) + f1b_ref[0]
    ff = jnp.maximum(ff, 0.0)
    ff = jnp.dot(ff, f2w_ref[0], preferred_element_type=f32) + f2b_ref[0]
    x = x + ff                                            # dropout2 = identity
    x_scr[...] = x

    # ---- epilogue (last layer step): fused electra/user heads ---------------
    @pl.when(layer == pl.num_programs(1) - 1)
    def _():
        out_ref[0] = jnp.dot(x, hw_ref[...], preferred_element_type=f32)


# ----------------------------------------------------------------------------
# Parameter init (deterministic, in-script) and one-time preparation
# ----------------------------------------------------------------------------
def init_params(key, *, user_cnt, feat_cnt, key_cnt, key_emb_size, dim_ff,
                num_layers):
    E = key_emb_size
    D = 3 * E
    keys = iter(jax.random.split(key, 64))
    nk = lambda: next(keys)

    def lin(shape, fan_in):
        b = 1.0 / math.sqrt(fan_in)
        return jax.random.uniform(nk(), shape, jnp.float32, -b, b)

    p = {}
    p["key_emb"] = 0.5 * jax.random.normal(nk(), (key_cnt, E), jnp.float32)
    p["user_emb"] = 0.5 * jax.random.normal(nk(), (user_cnt, D), jnp.float32)
    p["feat_w"] = lin((feat_cnt, E), feat_cnt)
    p["feat_b"] = lin((E,), feat_cnt)
    p["bn_gamma"] = jax.random.uniform(nk(), (E,), jnp.float32, 0.5, 1.5)
    p["bn_beta"] = 0.1 * jax.random.normal(nk(), (E,), jnp.float32)
    p["bn_mean"] = 0.1 * jax.random.normal(nk(), (E,), jnp.float32)
    p["bn_var"] = jax.random.uniform(nk(), (E,), jnp.float32, 0.5, 1.5)
    p["mlp1_w"] = lin((D, D), D)
    p["mlp1_b"] = lin((D,), D)
    p["mlp2_w"] = lin((D, D), D)
    p["mlp2_b"] = lin((D,), D)
    layers = []
    for _ in range(num_layers):
        layers.append({
            "ln1_g": jnp.ones((D,), jnp.float32), "ln1_b": jnp.zeros((D,), jnp.float32),
            "ln2_g": jnp.ones((D,), jnp.float32), "ln2_b": jnp.zeros((D,), jnp.float32),
            "qkv_w": lin((D, 3 * D), D), "qkv_b": lin((3 * D,), D),
            "out_w": lin((D, D), D), "out_b": lin((D,), D),
            "ff1_w": lin((D, dim_ff), D), "ff1_b": lin((dim_ff,), D),
            "ff2_w": lin((dim_ff, D), dim_ff), "ff2_b": lin((D,), dim_ff),
        })
    p["layers"] = layers
    p["electra_w"] = lin((D, 2), D)
    p["user_w"] = lin((D, 2), D)
    return p


def prepare_params(p, *, nhead):
    """One-time padding / stacking / BN-folding (never repeated per call)."""
    E = p["key_emb"].shape[1]
    D = 3 * E
    dim_ff = p["layers"][0]["ff1_w"].shape[1]
    Dp = _round_up(D, 128)
    FFp = _round_up(dim_ff, 128)
    Hp = 128
    hd = D // nhead
    hdp = Dp // nhead
    assert D % nhead == 0 and Dp % nhead == 0 and hdp >= hd, \
        "padded head layout requires Dp % nhead == 0 and Dp//nhead >= head_dim"

    # fold BatchNorm1d (eval, running stats) into feat_proj
    scale = p["bn_gamma"] * jax.lax.rsqrt(p["bn_var"] + 1e-5)
    feat_w = p["feat_w"] * scale[None, :]
    feat_b = (p["feat_b"] - p["bn_mean"]) * scale + p["bn_beta"]

    def padw(w, r, c):
        return jnp.zeros((r, c), jnp.float32).at[:w.shape[0], :w.shape[1]].set(w)

    def padv(v, n):
        return jnp.zeros((1, n), jnp.float32).at[0, :v.shape[0]].set(v)

    def pad_qkv(w, b):   # (D, 3D), (3D,) -> head-interleaved padded layout
        wp = jnp.zeros((Dp, 3 * Dp), jnp.float32)
        bp = jnp.zeros((1, 3 * Dp), jnp.float32)
        for part in range(3):
            for hi in range(nhead):
                sc = part * D + hi * hd
                dc = part * Dp + hi * hdp
                wp = wp.at[:D, dc:dc + hd].set(w[:, sc:sc + hd])
                bp = bp.at[0, dc:dc + hd].set(b[sc:sc + hd])
        return wp, bp

    def pad_outproj(w, b):   # rows follow the head-interleaved padded layout
        wp = jnp.zeros((Dp, Dp), jnp.float32)
        for hi in range(nhead):
            wp = wp.at[hi * hdp:hi * hdp + hd, :D].set(w[hi * hd:(hi + 1) * hd, :])
        return wp, padv(b, Dp)

    qw, qb, ow, ob = [], [], [], []
    for lp in p["layers"]:
        w1, b1 = pad_qkv(lp["qkv_w"], lp["qkv_b"]); qw.append(w1); qb.append(b1)
        w2, b2 = pad_outproj(lp["out_w"], lp["out_b"]); ow.append(w2); ob.append(b2)
    st = lambda xs: jnp.stack(xs, axis=0)
    layers = p["layers"]

    head_w = (jnp.zeros((Dp, Hp), jnp.float32)
              .at[:D, 0:2].set(p["electra_w"])
              .at[:D, 2:4].set(p["user_w"]))

    return {
        "key_emb": p["key_emb"], "user_emb": p["user_emb"],
        "feat_w": feat_w, "feat_b": feat_b,
        "mlp1_w": padw(p["mlp1_w"], Dp, Dp), "mlp1_b": padv(p["mlp1_b"], Dp),
        "mlp2_w": padw(p["mlp2_w"], Dp, Dp), "mlp2_b": padv(p["mlp2_b"], Dp),
        "ln1_g": st([padv(lp["ln1_g"], Dp) for lp in layers]),
        "ln1_b": st([padv(lp["ln1_b"], Dp) for lp in layers]),
        "ln2_g": st([padv(lp["ln2_g"], Dp) for lp in layers]),
        "ln2_b": st([padv(lp["ln2_b"], Dp) for lp in layers]),
        "qkv_w": st(qw), "qkv_b": st(qb),
        "out_w": st(ow), "out_b": st(ob),
        "ff1_w": st([padw(lp["ff1_w"], Dp, FFp) for lp in layers]),
        "ff1_b": st([padv(lp["ff1_b"], FFp) for lp in layers]),
        "ff2_w": st([padw(lp["ff2_w"], FFp, Dp) for lp in layers]),
        "ff2_b": st([padv(lp["ff2_b"], Dp) for lp in layers]),
        "head_w": head_w,
    }


# ----------------------------------------------------------------------------
# Forward pass (single fused pallas_call)
# ----------------------------------------------------------------------------
@functools.partial(jax.jit, static_argnames=("nhead", "causal", "use_user_emb"))
def stroke_net_forward(prep, b0, b1, feat, mask, user, *, nhead,
                       causal=False, use_user_emb=True):
    B, S, _ = feat.shape
    T = S + 1
    E = prep["key_emb"].shape[1]
    D = 3 * E
    Dp = prep["mlp1_w"].shape[0]
    FFp = prep["ff1_w"].shape[2]
    Hp = prep["head_w"].shape[1]
    L = prep["qkv_w"].shape[0]
    hd = D // nhead
    hdp = Dp // nhead

    # one-time prologue in plain JAX: embedding gathers + folded feat_proj/BN
    # TODO(synk): integer-index embedding gathers stay in XLA (no clean Pallas
    # TPU equivalent for tiny dynamic gathers).
    z = jnp.dot(feat, prep["feat_w"]) + prep["feat_b"]                   # (B,S,E)
    x = jnp.concatenate([prep["key_emb"][b0], prep["key_emb"][b1], z], axis=-1)
    x = jnp.concatenate([prep["user_emb"][user][:, None, :], x], axis=1)  # (B,T,D)
    x0 = jnp.pad(x, ((0, 0), (0, 0), (0, Dp - D)))                       # zero pads
    pe = jnp.pad(_positional_encoding(T, D), ((0, 0), (0, Dp - D)))
    bias = _attn_bias(mask, B, S, T, causal)

    kern = functools.partial(_stroke_net_kernel, d_real=D, nhead=nhead,
                             head_dim=hd, hd_pad=hdp, sqrt_d=math.sqrt(D))

    def _full(shape):
        zeros = (0,) * len(shape)
        return pl.BlockSpec(shape, lambda b, l: zeros)

    def _per_b(shape):
        rest = (0,) * (len(shape) - 1)
        return pl.BlockSpec(shape, lambda b, l: (b,) + rest)

    def _per_l(shape):
        rest = (0,) * (len(shape) - 1)
        return pl.BlockSpec(shape, lambda b, l: (l,) + rest)

    out = pl.pallas_call(
        kern,
        out_shape=jax.ShapeDtypeStruct((B, T, Hp), jnp.float32),
        grid_spec=pltpu.PrefetchScalarGridSpec(
            num_scalar_prefetch=0,
            grid=(B, L),
            in_specs=[
                _per_b((1, T, Dp)),                               # x0
                _full((T, Dp)),                                   # positional enc
                _full((Dp, Dp)), _full((1, Dp)),                  # input mlp 1
                _full((Dp, Dp)), _full((1, Dp)),                  # input mlp 2
                _per_b((1, T, T)),                                # attention bias
                _per_l((1, 1, Dp)), _per_l((1, 1, Dp)),           # ln1 g/b
                _per_l((1, Dp, 3 * Dp)), _per_l((1, 1, 3 * Dp)),  # qkv w/b
                _per_l((1, Dp, Dp)), _per_l((1, 1, Dp)),          # out proj w/b
                _per_l((1, 1, Dp)), _per_l((1, 1, Dp)),           # ln2 g/b
                _per_l((1, Dp, FFp)), _per_l((1, 1, FFp)),        # ffn linear1
                _per_l((1, FFp, Dp)), _per_l((1, 1, Dp)),         # ffn linear2
                _full((Dp, Hp)),                                  # packed heads
            ],
            out_specs=pl.BlockSpec((1, T, Hp), lambda b, l: (b, 0, 0)),
            scratch_shapes=[pltpu.VMEM((T, Dp), jnp.float32)],
        ),
        compiler_params=pltpu.CompilerParams(
            dimension_semantics=("parallel", "arbitrary")),
    )(x0, pe,
      prep["mlp1_w"], prep["mlp1_b"], prep["mlp2_w"], prep["mlp2_b"],
      bias,
      prep["ln1_g"], prep["ln1_b"], prep["qkv_w"], prep["qkv_b"],
      prep["out_w"], prep["out_b"], prep["ln2_g"], prep["ln2_b"],
      prep["ff1_w"], prep["ff1_b"], prep["ff2_w"], prep["ff2_b"],
      prep["head_w"])

    logits = out[:, 1:, 0:2]                       # electra_lin over strokes
    if use_user_emb:
        return logits, out[:, 0, 2:4]              # user_lin over user token
    return logits, None


# ----------------------------------------------------------------------------
# Pure-JAX reference (same math, unpadded) for a correctness self-check
# ----------------------------------------------------------------------------
def _ln_ref(x, g, b, eps=1e-5):
    mean = jnp.mean(x, axis=-1, keepdims=True)
    var = jnp.mean(jnp.square(x - mean), axis=-1, keepdims=True)
    return (x - mean) * jax.lax.rsqrt(var + eps) * g + b


def reference_forward(p, b0, b1, feat, mask, user, *, nhead, causal=False,
                      use_user_emb=True):
    E = p["key_emb"].shape[1]
    D = 3 * E
    B, S, _ = feat.shape
    T = S + 1
    hd = D // nhead
    z = feat @ p["feat_w"] + p["feat_b"]
    z = (z - p["bn_mean"]) * jax.lax.rsqrt(p["bn_var"] + 1e-5) * p["bn_gamma"] + p["bn_beta"]
    x = jnp.concatenate([p["key_emb"][b0], p["key_emb"][b1], z], axis=-1)
    x = jnp.concatenate([p["user_emb"][user][:, None, :], x], axis=1)
    x = jnp.maximum(x @ p["mlp1_w"] + p["mlp1_b"], 0.0)
    x = jnp.maximum(x @ p["mlp2_w"] + p["mlp2_b"], 0.0)
    x = x * math.sqrt(D) + _positional_encoding(T, D)[None]
    bias = _attn_bias(mask, B, S, T, causal)
    for lp in p["layers"]:
        h = _ln_ref(x, lp["ln1_g"], lp["ln1_b"])
        qkv = h @ lp["qkv_w"] + lp["qkv_b"]
        q, k, v = jnp.split(qkv, 3, axis=-1)
        q = q.reshape(B, T, nhead, hd).transpose(0, 2, 1, 3)
        k = k.reshape(B, T, nhead, hd).transpose(0, 2, 1, 3)
        v = v.reshape(B, T, nhead, hd).transpose(0, 2, 1, 3)
        s = jnp.einsum("bhqd,bhkd->bhqk", q, k) / math.sqrt(hd) + bias[:, None]
        pr = jax.nn.softmax(s, axis=-1)
        o = jnp.einsum("bhqk,bhkd->bhqd", pr, v).transpose(0, 2, 1, 3).reshape(B, T, D)
        x = x + (o @ lp["out_w"] + lp["out_b"])
        h2 = _ln_ref(x, lp["ln2_g"], lp["ln2_b"])
        ff = jnp.maximum(h2 @ lp["ff1_w"] + lp["ff1_b"], 0.0)
        x = x + (ff @ lp["ff2_w"] + lp["ff2_b"])
    logits = x[:, 1:] @ p["electra_w"]
    user_out = x[:, 0] @ p["user_w"] if use_user_emb else None
    return logits, user_out


# ----------------------------------------------------------------------------
# Main
# ----------------------------------------------------------------------------
if __name__ == "__main__":
    user_cnt, feat_cnt, key_cnt, key_emb_size = 10, 8, 20, 32
    dim_ff, num_heads, num_layers = 64, 4, 2
    B, S = 2, 8

    root = jax.random.PRNGKey(0)
    k_param, k_b0, k_b1, k_feat, k_user = jax.random.split(root, 5)

    raw = init_params(k_param, user_cnt=user_cnt, feat_cnt=feat_cnt,
                      key_cnt=key_cnt, key_emb_size=key_emb_size,
                      dim_ff=dim_ff, num_layers=num_layers)
    prep = prepare_params(raw, nhead=num_heads)

    b0 = jax.random.randint(k_b0, (B, S), 0, key_cnt)
    b1 = jax.random.randint(k_b1, (B, S), 0, key_cnt)
    feat = jax.random.normal(k_feat, (B, S, feat_cnt), jnp.float32)
    mask = jnp.zeros((B, S), jnp.bool_)    # src_key_padding_mask (no padding)
    user = jax.random.randint(k_user, (B,), 0, user_cnt)

    logits, user_out = stroke_net_forward(prep, b0, b1, feat, mask, user,
                                          nhead=num_heads, causal=False,
                                          use_user_emb=True)
    jax.block_until_ready((logits, user_out))
    assert logits.shape == (B, S, 2) and user_out.shape == (B, 2)

    # lightweight correctness self-check vs a pure-JAX reference
    ref_logits, ref_user = reference_forward(raw, b0, b1, feat, mask, user,
                                             nhead=num_heads, causal=False,
                                             use_user_emb=True)

    def _relerr(a, b):
        return float(jnp.max(jnp.abs(a - b)) / (jnp.max(jnp.abs(b)) + 1e-6))

    assert _relerr(logits, ref_logits) < 5e-2, "logits mismatch vs reference"
    assert _relerr(user_out, ref_user) < 5e-2, "user_out mismatch vs reference"

    print("KERNEL_OK")
</pallas_src>

<mosaic_0001>
module attributes {stable_mosaic.version = 11 : i64} {
  func.func @_stroke_net_kernel(%arg0: i32, %arg1: i32, %arg2: memref<1x9x128xf32, #tpu.memory_space<vmem>>, %arg3: memref<9x128xf32, #tpu.memory_space<vmem>>, %arg4: memref<128x128xf32, #tpu.memory_space<vmem>>, %arg5: memref<1x128xf32, #tpu.memory_space<vmem>>, %arg6: memref<128x128xf32, #tpu.memory_space<vmem>>, %arg7: memref<1x128xf32, #tpu.memory_space<vmem>>, %arg8: memref<1x9x9xf32, #tpu.memory_space<vmem>>, %arg9: memref<1x1x128xf32, #tpu.memory_space<vmem>>, %arg10: memref<1x1x128xf32, #tpu.memory_space<vmem>>, %arg11: memref<1x128x384xf32, #tpu.memory_space<vmem>>, %arg12: memref<1x1x384xf32, #tpu.memory_space<vmem>>, %arg13: memref<1x128x128xf32, #tpu.memory_space<vmem>>, %arg14: memref<1x1x128xf32, #tpu.memory_space<vmem>>, %arg15: memref<1x1x128xf32, #tpu.memory_space<vmem>>, %arg16: memref<1x1x128xf32, #tpu.memory_space<vmem>>, %arg17: memref<1x128x128xf32, #tpu.memory_space<vmem>>, %arg18: memref<1x1x128xf32, #tpu.memory_space<vmem>>, %arg19: memref<1x128x128xf32, #tpu.memory_space<vmem>>, %arg20: memref<1x1x128xf32, #tpu.memory_space<vmem>>, %arg21: memref<128x128xf32, #tpu.memory_space<vmem>>, %arg22: memref<1x9x128xf32, #tpu.memory_space<vmem>>, %arg23: memref<9x128xf32, #tpu.memory_space<vmem>>) attributes {dimension_semantics = [#tpu.dimension_semantics<parallel>, #tpu.dimension_semantics<arbitrary>], iteration_bounds = array<i64: 2, 2>, scalar_prefetch = 0 : i64, scratch_operands = 1 : i64, tpu.core_type = #tpu.core_type<tc>, window_params = [{transform_indices = @transform_0, window_bounds = array<i64: 1, 9, 128>}, {pipeline_mode = #tpu.pipeline_mode<synchronous>, transform_indices = @transform_1, window_bounds = array<i64: 9, 128>}, {pipeline_mode = #tpu.pipeline_mode<synchronous>, transform_indices = @transform_2, window_bounds = array<i64: 128, 128>}, {pipeline_mode = #tpu.pipeline_mode<synchronous>, transform_indices = @transform_3, window_bounds = array<i64: 1, 128>}, {pipeline_mode = #tpu.pipeline_mode<synchronous>, transform_indices = @transform_4, window_bounds = array<i64: 128, 128>}, {pipeline_mode = #tpu.pipeline_mode<synchronous>, transform_indices = @transform_5, window_bounds = array<i64: 1, 128>}, {transform_indices = @transform_6, window_bounds = array<i64: 1, 9, 9>}, {transform_indices = @transform_7, window_bounds = array<i64: 1, 1, 128>}, {transform_indices = @transform_8, window_bounds = array<i64: 1, 1, 128>}, {transform_indices = @transform_9, window_bounds = array<i64: 1, 128, 384>}, {transform_indices = @transform_10, window_bounds = array<i64: 1, 1, 384>}, {transform_indices = @transform_11, window_bounds = array<i64: 1, 128, 128>}, {transform_indices = @transform_12, window_bounds = array<i64: 1, 1, 128>}, {transform_indices = @transform_13, window_bounds = array<i64: 1, 1, 128>}, {transform_indices = @transform_14, window_bounds = array<i64: 1, 1, 128>}, {transform_indices = @transform_15, window_bounds = array<i64: 1, 128, 128>}, {transform_indices = @transform_16, window_bounds = array<i64: 1, 1, 128>}, {transform_indices = @transform_17, window_bounds = array<i64: 1, 128, 128>}, {transform_indices = @transform_18, window_bounds = array<i64: 1, 1, 128>}, {pipeline_mode = #tpu.pipeline_mode<synchronous>, transform_indices = @transform_19, window_bounds = array<i64: 128, 128>}, {transform_indices = @transform_20, window_bounds = array<i64: 1, 9, 128>}]} {
    %0 = tpu.iota {dimensions = array<i32: 1>} : vector<9x128xi32>
    %c96_i32 = arith.constant 96 : i32
    %1 = vector.broadcast %c96_i32 : i32 to vector<9x128xi32>
    %2 = arith.cmpi slt, %0, %1 : vector<9x128xi32>
    %3 = arith.extui %2 : vector<9x128xi1> to vector<9x128xi32>
    %4 = arith.sitofp %3 : vector<9x128xi32> to vector<9x128xf32>
    %c0_i32 = arith.constant 0 : i32
    %5 = arith.cmpi eq, %arg1, %c0_i32 : i32
    %6 = arith.extui %5 : i1 to i32
    %c0_i32_0 = arith.constant 0 : i32
    %7 = arith.cmpi ne, %6, %c0_i32_0 : i32
    scf.if %7 {
      %c0_78 = arith.constant 0 : index
      %c0_79 = arith.constant 0 : index
      %c0_80 = arith.constant 0 : index
      %170 = vector.load %arg2[%c0_78, %c0_79, %c0_80] : memref<1x9x128xf32, #tpu.memory_space<vmem>>, vector<1x9x128xf32>
      %171 = vector.shape_cast %170 : vector<1x9x128xf32> to vector<9x128xf32>
      %c0_81 = arith.constant 0 : index
      %c0_82 = arith.constant 0 : index
      %172 = vector.load %arg4[%c0_81, %c0_82] : memref<128x128xf32, #tpu.memory_space<vmem>>, vector<128x128xf32>
      %cst_83 = arith.constant dense<0.000000e+00> : vector<9x128xf32>
      %173 = tpu.matmul %171, %172, %cst_83 {dimension_numbers = #tpu.dot_dimension_numbers<[1], [0], [0], [1], [0, 0, 1, 1], [], []>} : vector<9x128xf32>, vector<128x128xf32>, vector<9x128xf32> -> vector<9x128xf32>
      %c0_84 = arith.constant 0 : index
      %c0_85 = arith.constant 0 : index
      %174 = vector.load %arg5[%c0_84, %c0_85] : memref<1x128xf32, #tpu.memory_space<vmem>>, vector<1x128xf32>
      %175 = vector.broadcast %174 : vector<1x128xf32> to vector<9x128xf32>
      %176 = arith.addf %173, %175 : vector<9x128xf32>
      %cst_86 = arith.constant 0.000000e+00 : f32
      %177 = vector.broadcast %cst_86 : f32 to vector<9x128xf32>
      %178 = arith.maximumf %176, %177 : vector<9x128xf32>
      %c0_87 = arith.constant 0 : index
      %c0_88 = arith.constant 0 : index
      %179 = vector.load %arg6[%c0_87, %c0_88] : memref<128x128xf32, #tpu.memory_space<vmem>>, vector<128x128xf32>
      %cst_89 = arith.constant dense<0.000000e+00> : vector<9x128xf32>
      %180 = tpu.matmul %178, %179, %cst_89 {dimension_numbers = #tpu.dot_dimension_numbers<[1], [0], [0], [1], [0, 0, 1, 1], [], []>} : vector<9x128xf32>, vector<128x128xf32>, vector<9x128xf32> -> vector<9x128xf32>
      %c0_90 = arith.constant 0 : index
      %c0_91 = arith.constant 0 : index
      %181 = vector.load %arg7[%c0_90, %c0_91] : memref<1x128xf32, #tpu.memory_space<vmem>>, vector<1x128xf32>
      %182 = vector.broadcast %181 : vector<1x128xf32> to vector<9x128xf32>
      %183 = arith.addf %180, %182 : vector<9x128xf32>
      %cst_92 = arith.constant 0.000000e+00 : f32
      %184 = vector.broadcast %cst_92 : f32 to vector<9x128xf32>
      %185 = arith.maximumf %183, %184 : vector<9x128xf32>
      %cst_93 = arith.constant 9.79795932 : f32
      %186 = vector.broadcast %cst_93 : f32 to vector<9x128xf32>
      %187 = arith.mulf %185, %186 : vector<9x128xf32>
      %c0_94 = arith.constant 0 : index
      %c0_95 = arith.constant 0 : index
      %188 = vector.load %arg3[%c0_94, %c0_95] : memref<9x128xf32, #tpu.memory_space<vmem>>, vector<9x128xf32>
      %189 = arith.addf %187, %188 : vector<9x128xf32>
      %c0_96 = arith.constant 0 : index
      %c0_97 = arith.constant 0 : index
      %190 = vector.load %arg23[%c0_96, %c0_97] : memref<9x128xf32, #tpu.memory_space<vmem>>, vector<9x128xf32>
      tpu.vector_store %arg23[%c0_96, %c0_97], %189 {strides = array<i32>} : memref<9x128xf32, #tpu.memory_space<vmem>>, vector<9x128xf32>,
    } else {
    }
    %c0 = arith.constant 0 : index
    %c0_1 = arith.constant 0 : index
    %8 = vector.load %arg23[%c0, %c0_1] : memref<9x128xf32, #tpu.memory_space<vmem>>, vector<9x128xf32>
    %c0_2 = arith.constant 0 : index
    %c0_3 = arith.constant 0 : index
    %c0_4 = arith.constant 0 : index
    %9 = vector.load %arg9[%c0_2, %c0_3, %c0_4] : memref<1x1x128xf32, #tpu.memory_space<vmem>>, vector<1x1x128xf32>
    %10 = vector.shape_cast %9 : vector<1x1x128xf32> to vector<1x128xf32>
    %c0_5 = arith.constant 0 : index
    %c0_6 = arith.constant 0 : index
    %c0_7 = arith.constant 0 : index
    %11 = vector.load %arg10[%c0_5, %c0_6, %c0_7] : memref<1x1x128xf32, #tpu.memory_space<vmem>>, vector<1x1x128xf32>
    %12 = vector.shape_cast %11 : vector<1x1x128xf32> to vector<1x128xf32>
    %cst = arith.constant dense<0.000000e+00> : vector<9xf32>
    %13 = vector.multi_reduction <add>, %8, %cst [1] : vector<9x128xf32> to vector<9xf32>
    %14 = vector.shape_cast %13 : vector<9xf32> to vector<9x1xf32>
    %cst_8 = arith.constant 0.010416667 : f32
    %15 = vector.broadcast %cst_8 : f32 to vector<9x1xf32>
    %16 = arith.mulf %14, %15 : vector<9x1xf32>
    %17 = vector.broadcast %16 : vector<9x1xf32> to vector<9x128xf32>
    %18 = arith.subf %8, %17 : vector<9x128xf32>
    %19 = arith.mulf %18, %4 : vector<9x128xf32>
    %20 = arith.mulf %19, %19 : vector<9x128xf32>
    %cst_9 = arith.constant dense<0.000000e+00> : vector<9xf32>
    %21 = vector.multi_reduction <add>, %20, %cst_9 [1] : vector<9x128xf32> to vector<9xf32>
    %22 = vector.shape_cast %21 : vector<9xf32> to vector<9x1xf32>
    %cst_10 = arith.constant 0.010416667 : f32
    %23 = vector.broadcast %cst_10 : f32 to vector<9x1xf32>
    %24 = arith.mulf %22, %23 : vector<9x1xf32>
    %cst_11 = arith.constant 9.99999974E-6 : f32
    %25 = vector.broadcast %cst_11 : f32 to vector<9x1xf32>
    %26 = arith.addf %24, %25 : vector<9x1xf32>
    %27 = math.rsqrt %26 : vector<9x1xf32>
    %28 = vector.broadcast %27 : vector<9x1xf32> to vector<9x128xf32>
    %29 = arith.mulf %19, %28 : vector<9x128xf32>
    %30 = vector.broadcast %10 : vector<1x128xf32> to vector<9x128xf32>
    %31 = arith.mulf %29, %30 : vector<9x128xf32>
    %32 = vector.broadcast %12 : vector<1x128xf32> to vector<9x128xf32>
    %33 = arith.addf %31, %32 : vector<9x128xf32>
    %c0_12 = arith.constant 0 : index
    %c0_13 = arith.constant 0 : index
    %c0_14 = arith.constant 0 : index
    %34 = vector.load %arg11[%c0_12, %c0_13, %c0_14] : memref<1x128x384xf32, #tpu.memory_space<vmem>>, vector<1x128x384xf32>
    %35 = vector.shape_cast %34 : vector<1x128x384xf32> to vector<128x384xf32>
    %cst_15 = arith.constant dense<0.000000e+00> : vector<9x384xf32>
    %36 = tpu.matmul %33, %35, %cst_15 {dimension_numbers = #tpu.dot_dimension_numbers<[1], [0], [0], [1], [0, 0, 1, 1], [], []>} : vector<9x128xf32>, vector<128x384xf32>, vector<9x384xf32> -> vector<9x384xf32>
    %c0_16 = arith.constant 0 : index
    %c0_17 = arith.constant 0 : index
    %c0_18 = arith.constant 0 : index
    %37 = vector.load %arg12[%c0_16, %c0_17, %c0_18] : memref<1x1x384xf32, #tpu.memory_space<vmem>>, vector<1x1x384xf32>
    %38 = vector.shape_cast %37 : vector<1x1x384xf32> to vector<1x384xf32>
    %39 = vector.broadcast %38 : vector<1x384xf32> to vector<9x384xf32>
    %40 = arith.addf %36, %39 : vector<9x384xf32>
    %c0_19 = arith.constant 0 : index
    %c0_20 = arith.constant 0 : index
    %c0_21 = arith.constant 0 : index
    %41 = vector.load %arg8[%c0_19, %c0_20, %c0_21] : memref<1x9x9xf32, #tpu.memory_space<vmem>>, vector<1x9x9xf32>
    %42 = vector.shape_cast %41 : vector<1x9x9xf32> to vector<9x9xf32>
    %43 = vector.extract_strided_slice %40 {offsets = [0, 0], sizes = [9, 32], strides = [1, 1]} : vector<9x384xf32> to vector<9x32xf32>
    %44 = vector.extract_strided_slice %40 {offsets = [0, 128], sizes = [9, 32], strides = [1, 1]} : vector<9x384xf32> to vector<9x32xf32>
    %45 = vector.extract_strided_slice %40 {offsets = [0, 256], sizes = [9, 32], strides = [1, 1]} : vector<9x384xf32> to vector<9x32xf32>
    %cst_22 = arith.constant dense<0.000000e+00> : vector<9x9xf32>
    %46 = tpu.matmul %43, %44, %cst_22 {dimension_numbers = #tpu.dot_dimension_numbers<[1], [1], [0], [0], [0, 0, 1, 0], [], []>} : vector<9x32xf32>, vector<9x32xf32>, vector<9x9xf32> -> vector<9x9xf32>
    %cst_23 = arith.constant 0.204124153 : f32
    %47 = vector.broadcast %cst_23 : f32 to vector<9x9xf32>
    %48 = arith.mulf %46, %47 : vector<9x9xf32>
    %49 = arith.addf %48, %42 : vector<9x9xf32>
    %cst_24 = arith.constant dense<0xFF800000> : vector<9xf32>
    %50 = vector.multi_reduction <maximumf>, %49, %cst_24 [1] : vector<9x9xf32> to vector<9xf32>
    %51 = vector.shape_cast %50 : vector<9xf32> to vector<9x1xf32>
    %52 = vector.broadcast %51 : vector<9x1xf32> to vector<9x9xf32>
    %53 = arith.subf %49, %52 : vector<9x9xf32>
    %54 = math.exp %53 : vector<9x9xf32>
    %cst_25 = arith.constant dense<0.000000e+00> : vector<9xf32>
    %55 = vector.multi_reduction <add>, %54, %cst_25 [1] : vector<9x9xf32> to vector<9xf32>
    %56 = vector.shape_cast %55 : vector<9xf32> to vector<9x1xf32>
    %57 = tpu.reciprocal %56 {approx = true} : vector<9x1xf32> -> vector<9x1xf32>
    %58 = vector.broadcast %57 : vector<9x1xf32> to vector<9x9xf32>
    %59 = arith.mulf %54, %58 : vector<9x9xf32>
    %cst_26 = arith.constant dense<0.000000e+00> : vector<9x32xf32>
    %60 = tpu.matmul %59, %45, %cst_26 {dimension_numbers = #tpu.dot_dimension_numbers<[1], [0], [0], [1], [0, 0, 1, 1], [], []>} : vector<9x9xf32>, vector<9x32xf32>, vector<9x32xf32> -> vector<9x32xf32>
    %61 = vector.extract_strided_slice %40 {offsets = [0, 32], sizes = [9, 32], strides = [1, 1]} : vector<9x384xf32> to vector<9x32xf32>
    %62 = vector.extract_strided_slice %40 {offsets = [0, 160], sizes = [9, 32], strides = [1, 1]} : vector<9x384xf32> to vector<9x32xf32>
    %63 = vector.extract_strided_slice %40 {offsets = [0, 288], sizes = [9, 32], strides = [1, 1]} : vector<9x384xf32> to vector<9x32xf32>
    %cst_27 = arith.constant dense<0.000000e+00> : vector<9x9xf32>
    %64 = tpu.matmul %61, %62, %cst_27 {dimension_numbers = #tpu.dot_dimension_numbers<[1], [1], [0], [0], [0, 0, 1, 0], [], []>} : vector<9x32xf32>, vector<9x32xf32>, vector<9x9xf32> -> vector<9x9xf32>
    %cst_28 = arith.constant 0.204124153 : f32
    %65 = vector.broadcast %cst_28 : f32 to vector<9x9xf32>
    %66 = arith.mulf %64, %65 : vector<9x9xf32>
    %67 = arith.addf %66, %42 : vector<9x9xf32>
    %cst_29 = arith.constant dense<0xFF800000> : vector<9xf32>
    %68 = vector.multi_reduction <maximumf>, %67, %cst_29 [1] : vector<9x9xf32> to vector<9xf32>
    %69 = vector.shape_cast %68 : vector<9xf32> to vector<9x1xf32>
    %70 = vector.broadcast %69 : vector<9x1xf32> to vector<9x9xf32>
    %71 = arith.subf %67, %70 : vector<9x9xf32>
    %72 = math.exp %71 : vector<9x9xf32>
    %cst_30 = arith.constant dense<0.000000e+00> : vector<9xf32>
    %73 = vector.multi_reduction <add>, %72, %cst_30 [1] : vector<9x9xf32> to vector<9xf32>
    %74 = vector.shape_cast %73 : vector<9xf32> to vector<9x1xf32>
    %75 = tpu.reciprocal %74 {approx = true} : vector<9x1xf32> -> vector<9x1xf32>
    %76 = vector.broadcast %75 : vector<9x1xf32> to vector<9x9xf32>
    %77 = arith.mulf %72, %76 : vector<9x9xf32>
    %cst_31 = arith.constant dense<0.000000e+00> : vector<9x32xf32>
    %78 = tpu.matmul %77, %63, %cst_31 {dimension_numbers = #tpu.dot_dimension_numbers<[1], [0], [0], [1], [0, 0, 1, 1], [], []>} : vector<9x9xf32>, vector<9x32xf32>, vector<9x32xf32> -> vector<9x32xf32>
    %79 = vector.extract_strided_slice %40 {offsets = [0, 64], sizes = [9, 32], strides = [1, 1]} : vector<9x384xf32> to vector<9x32xf32>
    %80 = vector.extract_strided_slice %40 {offsets = [0, 192], sizes = [9, 32], strides = [1, 1]} : vector<9x384xf32> to vector<9x32xf32>
    %81 = vector.extract_strided_slice %40 {offsets = [0, 320], sizes = [9, 32], strides = [1, 1]} : vector<9x384xf32> to vector<9x32xf32>
    %cst_32 = arith.constant dense<0.000000e+00> : vector<9x9xf32>
    %82 = tpu.matmul %79, %80, %cst_32 {dimension_numbers = #tpu.dot_dimension_numbers<[1], [1], [0], [0], [0, 0, 1, 0], [], []>} : vector<9x32xf32>, vector<9x32xf32>, vector<9x9xf32> -> vector<9x9xf32>
    %cst_33 = arith.constant 0.204124153 : f32
    %83 = vector.broadcast %cst_33 : f32 to vector<9x9xf32>
    %84 = arith.mulf %82, %83 : vector<9x9xf32>
    %85 = arith.addf %84, %42 : vector<9x9xf32>
    %cst_34 = arith.constant dense<0xFF800000> : vector<9xf32>
    %86 = vector.multi_reduction <maximumf>, %85, %cst_34 [1] : vector<9x9xf32> to vector<9xf32>
    %87 = vector.shape_cast %86 : vector<9xf32> to vector<9x1xf32>
    %88 = vector.broadcast %87 : vector<9x1xf32> to vector<9x9xf32>
    %89 = arith.subf %85, %88 : vector<9x9xf32>
    %90 = math.exp %89 : vector<9x9xf32>
    %cst_35 = arith.constant dense<0.000000e+00> : vector<9xf32>
    %91 = vector.multi_reduction <add>, %90, %cst_35 [1] : vector<9x9xf32> to vector<9xf32>
    %92 = vector.shape_cast %91 : vector<9xf32> to vector<9x1xf32>
    %93 = tpu.reciprocal %92 {approx = true} : vector<9x1xf32> -> vector<9x1xf32>
    %94 = vector.broadcast %93 : vector<9x1xf32> to vector<9x9xf32>
    %95 = arith.mulf %90, %94 : vector<9x9xf32>
    %cst_36 = arith.constant dense<0.000000e+00> : vector<9x32xf32>
    %96 = tpu.matmul %95, %81, %cst_36 {dimension_numbers = #tpu.dot_dimension_numbers<[1], [0], [0], [1], [0, 0, 1, 1], [], []>} : vector<9x9xf32>, vector<9x32xf32>, vector<9x32xf32> -> vector<9x32xf32>
    %97 = vector.extract_strided_slice %40 {offsets = [0, 96], sizes = [9, 32], strides = [1, 1]} : vector<9x384xf32> to vector<9x32xf32>
    %98 = vector.extract_strided_slice %40 {offsets = [0, 224], sizes = [9, 32], strides = [1, 1]} : vector<9x384xf32> to vector<9x32xf32>
    %99 = vector.extract_strided_slice %40 {offsets = [0, 352], sizes = [9, 32], strides = [1, 1]} : vector<9x384xf32> to vector<9x32xf32>
    %cst_37 = arith.constant dense<0.000000e+00> : vector<9x9xf32>
    %100 = tpu.matmul %97, %98, %cst_37 {dimension_numbers = #tpu.dot_dimension_numbers<[1], [1], [0], [0], [0, 0, 1, 0], [], []>} : vector<9x32xf32>, vector<9x32xf32>, vector<9x9xf32> -> vector<9x9xf32>
    %cst_38 = arith.constant 0.204124153 : f32
    %101 = vector.broadcast %cst_38 : f32 to vector<9x9xf32>
    %102 = arith.mulf %100, %101 : vector<9x9xf32>
    %103 = arith.addf %102, %42 : vector<9x9xf32>
    %cst_39 = arith.constant dense<0xFF800000> : vector<9xf32>
    %104 = vector.multi_reduction <maximumf>, %103, %cst_39 [1] : vector<9x9xf32> to vector<9xf32>
    %105 = vector.shape_cast %104 : vector<9xf32> to vector<9x1xf32>
    %106 = vector.broadcast %105 : vector<9x1xf32> to vector<9x9xf32>
    %107 = arith.subf %103, %106 : vector<9x9xf32>
    %108 = math.exp %107 : vector<9x9xf32>
    %cst_40 = arith.constant dense<0.000000e+00> : vector<9xf32>
    %109 = vector.multi_reduction <add>, %108, %cst_40 [1] : vector<9x9xf32> to vector<9xf32>
    %110 = vector.shape_cast %109 : vector<9xf32> to vector<9x1xf32>
    %111 = tpu.reciprocal %110 {approx = true} : vector<9x1xf32> -> vector<9x1xf32>
    %112 = vector.broadcast %111 : vector<9x1xf32> to vector<9x9xf32>
    %113 = arith.mulf %108, %112 : vector<9x9xf32>
    %cst_41 = arith.constant dense<0.000000e+00> : vector<9x32xf32>
    %114 = tpu.matmul %113, %99, %cst_41 {dimension_numbers = #tpu.dot_dimension_numbers<[1], [0], [0], [1], [0, 0, 1, 1], [], []>} : vector<9x9xf32>, vector<9x32xf32>, vector<9x32xf32> -> vector<9x32xf32>
    %115 = tpu.concatenate %60, %78, %96, %114 in 1 : vector<9x32xf32>, vector<9x32xf32>, vector<9x32xf32>, vector<9x32xf32> -> vector<9x128xf32>
    %c0_42 = arith.constant 0 : index
    %c0_43 = arith.constant 0 : index
    %c0_44 = arith.constant 0 : index
    %116 = vector.load %arg13[%c0_42, %c0_43, %c0_44] : memref<1x128x128xf32, #tpu.memory_space<vmem>>, vector<1x128x128xf32>
    %117 = vector.shape_cast %116 : vector<1x128x128xf32> to vector<128x128xf32>
    %cst_45 = arith.constant dense<0.000000e+00> : vector<9x128xf32>
    %118 = tpu.matmul %115, %117, %cst_45 {dimension_numbers = #tpu.dot_dimension_numbers<[1], [0], [0], [1], [0, 0, 1, 1], [], []>} : vector<9x128xf32>, vector<128x128xf32>, vector<9x128xf32> -> vector<9x128xf32>
    %c0_46 = arith.constant 0 : index
    %c0_47 = arith.constant 0 : index
    %c0_48 = arith.constant 0 : index
    %119 = vector.load %arg14[%c0_46, %c0_47, %c0_48] : memref<1x1x128xf32, #tpu.memory_space<vmem>>, vector<1x1x128xf32>
    %120 = vector.shape_cast %119 : vector<1x1x128xf32> to vector<1x128xf32>
    %121 = vector.broadcast %120 : vector<1x128xf32> to vector<9x128xf32>
    %122 = arith.addf %118, %121 : vector<9x128xf32>
    %123 = arith.addf %8, %122 : vector<9x128xf32>
    %c0_49 = arith.constant 0 : index
    %c0_50 = arith.constant 0 : index
    %c0_51 = arith.constant 0 : index
    %124 = vector.load %arg15[%c0_49, %c0_50, %c0_51] : memref<1x1x128xf32, #tpu.memory_space<vmem>>, vector<1x1x128xf32>
    %125 = vector.shape_cast %124 : vector<1x1x128xf32> to vector<1x128xf32>
    %c0_52 = arith.constant 0 : index
    %c0_53 = arith.constant 0 : index
    %c0_54 = arith.constant 0 : index
    %126 = vector.load %arg16[%c0_52, %c0_53, %c0_54] : memref<1x1x128xf32, #tpu.memory_space<vmem>>, vector<1x1x128xf32>
    %127 = vector.shape_cast %126 : vector<1x1x128xf32> to vector<1x128xf32>
    %cst_55 = arith.constant dense<0.000000e+00> : vector<9xf32>
    %128 = vector.multi_reduction <add>, %123, %cst_55 [1] : vector<9x128xf32> to vector<9xf32>
    %129 = vector.shape_cast %128 : vector<9xf32> to vector<9x1xf32>
    %cst_56 = arith.constant 0.010416667 : f32
    %130 = vector.broadcast %cst_56 : f32 to vector<9x1xf32>
    %131 = arith.mulf %129, %130 : vector<9x1xf32>
    %132 = vector.broadcast %131 : vector<9x1xf32> to vector<9x128xf32>
    %133 = arith.subf %123, %132 : vector<9x128xf32>
    %134 = arith.mulf %133, %4 : vector<9x128xf32>
    %135 = arith.mulf %134, %134 : vector<9x128xf32>
    %cst_57 = arith.constant dense<0.000000e+00> : vector<9xf32>
    %136 = vector.multi_reduction <add>, %135, %cst_57 [1] : vector<9x128xf32> to vector<9xf32>
    %137 = vector.shape_cast %136 : vector<9xf32> to vector<9x1xf32>
    %cst_58 = arith.constant 0.010416667 : f32
    %138 = vector.broadcast %cst_58 : f32 to vector<9x1xf32>
    %139 = arith.mulf %137, %138 : vector<9x1xf32>
    %cst_59 = arith.constant 9.99999974E-6 : f32
    %140 = vector.broadcast %cst_59 : f32 to vector<9x1xf32>
    %141 = arith.addf %139, %140 : vector<9x1xf32>
    %142 = math.rsqrt %141 : vector<9x1xf32>
    %143 = vector.broadcast %142 : vector<9x1xf32> to vector<9x128xf32>
    %144 = arith.mulf %134, %143 : vector<9x128xf32>
    %145 = vector.broadcast %125 : vector<1x128xf32> to vector<9x128xf32>
    %146 = arith.mulf %144, %145 : vector<9x128xf32>
    %147 = vector.broadcast %127 : vector<1x128xf32> to vector<9x128xf32>
    %148 = arith.addf %146, %147 : vector<9x128xf32>
    %c0_60 = arith.constant 0 : index
    %c0_61 = arith.constant 0 : index
    %c0_62 = arith.constant 0 : index
    %149 = vector.load %arg17[%c0_60, %c0_61, %c0_62] : memref<1x128x128xf32, #tpu.memory_space<vmem>>, vector<1x128x128xf32>
    %150 = vector.shape_cast %149 : vector<1x128x128xf32> to vector<128x128xf32>
    %cst_63 = arith.constant dense<0.000000e+00> : vector<9x128xf32>
    %151 = tpu.matmul %148, %150, %cst_63 {dimension_numbers = #tpu.dot_dimension_numbers<[1], [0], [0], [1], [0, 0, 1, 1], [], []>} : vector<9x128xf32>, vector<128x128xf32>, vector<9x128xf32> -> vector<9x128xf32>
    %c0_64 = arith.constant 0 : index
    %c0_65 = arith.constant 0 : index
    %c0_66 = arith.constant 0 : index
    %152 = vector.load %arg18[%c0_64, %c0_65, %c0_66] : memref<1x1x128xf32, #tpu.memory_space<vmem>>, vector<1x1x128xf32>
    %153 = vector.shape_cast %152 : vector<1x1x128xf32> to vector<1x128xf32>
    %154 = vector.broadcast %153 : vector<1x128xf32> to vector<9x128xf32>
    %155 = arith.addf %151, %154 : vector<9x128xf32>
    %cst_67 = arith.constant 0.000000e+00 : f32
    %156 = vector.broadcast %cst_67 : f32 to vector<9x128xf32>
    %157 = arith.maximumf %155, %156 : vector<9x128xf32>
    %c0_68 = arith.constant 0 : index
    %c0_69 = arith.constant 0 : index
    %c0_70 = arith.constant 0 : index
    %158 = vector.load %arg19[%c0_68, %c0_69, %c0_70] : memref<1x128x128xf32, #tpu.memory_space<vmem>>, vector<1x128x128xf32>
    %159 = vector.shape_cast %158 : vector<1x128x128xf32> to vector<128x128xf32>
    %cst_71 = arith.constant dense<0.000000e+00> : vector<9x128xf32>
    %160 = tpu.matmul %157, %159, %cst_71 {dimension_numbers = #tpu.dot_dimension_numbers<[1], [0], [0], [1], [0, 0, 1, 1], [], []>} : vector<9x128xf32>, vector<128x128xf32>, vector<9x128xf32> -> vector<9x128xf32>
    %c0_72 = arith.constant 0 : index
    %c0_73 = arith.constant 0 : index
    %c0_74 = arith.constant 0 : index
    %161 = vector.load %arg20[%c0_72, %c0_73, %c0_74] : memref<1x1x128xf32, #tpu.memory_space<vmem>>, vector<1x1x128xf32>
    %162 = vector.shape_cast %161 : vector<1x1x128xf32> to vector<1x128xf32>
    %163 = vector.broadcast %162 : vector<1x128xf32> to vector<9x128xf32>
    %164 = arith.addf %160, %163 : vector<9x128xf32>
    %165 = arith.addf %123, %164 : vector<9x128xf32>
    %c0_75 = arith.constant 0 : index
    %c0_76 = arith.constant 0 : index
    %166 = vector.load %arg23[%c0_75, %c0_76] : memref<9x128xf32, #tpu.memory_space<vmem>>, vector<9x128xf32>
    tpu.vector_store %arg23[%c0_75, %c0_76], %165 {strides = array<i32>} : memref<9x128xf32, #tpu.memory_space<vmem>>, vector<9x128xf32>,
    %c1_i32 = arith.constant 1 : i32
    %167 = arith.cmpi eq, %arg1, %c1_i32 : i32
    %168 = arith.extui %167 : i1 to i32
    %c0_i32_77 = arith.constant 0 : i32
    %169 = arith.cmpi ne, %168, %c0_i32_77 : i32
    scf.if %169 {
      %c0_78 = arith.constant 0 : index
      %c0_79 = arith.constant 0 : index
      %170 = vector.load %arg21[%c0_78, %c0_79] : memref<128x128xf32, #tpu.memory_space<vmem>>, vector<128x128xf32>
      %cst_80 = arith.constant dense<0.000000e+00> : vector<9x128xf32>
      %171 = tpu.matmul %165, %170, %cst_80 {dimension_numbers = #tpu.dot_dimension_numbers<[1], [0], [0], [1], [0, 0, 1, 1], [], []>} : vector<9x128xf32>, vector<128x128xf32>, vector<9x128xf32> -> vector<9x128xf32>
      %c0_81 = arith.constant 0 : index
      %c0_82 = arith.constant 0 : index
      %c0_83 = arith.constant 0 : index
      %172 = vector.load %arg22[%c0_81, %c0_82, %c0_83] : memref<1x9x128xf32, #tpu.memory_space<vmem>>, vector<1x9x128xf32>
      %173 = vector.shape_cast %172 : vector<1x9x128xf32> to vector<9x128xf32>
      %174 = vector.shape_cast %171 : vector<9x128xf32> to vector<1x9x128xf32>
      tpu.vector_store %arg22[%c0_81, %c0_82, %c0_83], %174 {strides = array<i32>} : memref<1x9x128xf32, #tpu.memory_space<vmem>>, vector<1x9x128xf32>,
    } else {
    }
    return
  }
  func.func @transform_0(%arg0: i32, %arg1: i32) -> (i32, i32, i32) {
    %c0_i32 = arith.constant 0 : i32
    %c0_i32_0 = arith.constant 0 : i32
    %c0_i32_1 = arith.constant 0 : i32
    return %arg0, %c0_i32, %c0_i32_0 : i32, i32, i32
  }
  func.func @transform_1(%arg0: i32, %arg1: i32) -> (i32, i32) {
    %c0_i32 = arith.constant 0 : i32
    %c0_i32_0 = arith.constant 0 : i32
    %c0_i32_1 = arith.constant 0 : i32
    return %c0_i32, %c0_i32_0 : i32, i32
  }
  func.func @transform_2(%arg0: i32, %arg1: i32) -> (i32, i32) {
    %c0_i32 = arith.constant 0 : i32
    %c0_i32_0 = arith.constant 0 : i32
    %c0_i32_1 = arith.constant 0 : i32
    return %c0_i32, %c0_i32_0 : i32, i32
  }
  func.func @transform_3(%arg0: i32, %arg1: i32) -> (i32, i32) {
    %c0_i32 = arith.constant 0 : i32
    %c0_i32_0 = arith.constant 0 : i32
    %c0_i32_1 = arith.constant 0 : i32
    return %c0_i32, %c0_i32_0 : i32, i32
  }
  func.func @transform_4(%arg0: i32, %arg1: i32) -> (i32, i32) {
    %c0_i32 = arith.constant 0 : i32
    %c0_i32_0 = arith.constant 0 : i32
    %c0_i32_1 = arith.constant 0 : i32
    return %c0_i32, %c0_i32_0 : i32, i32
  }
  func.func @transform_5(%arg0: i32, %arg1: i32) -> (i32, i32) {
    %c0_i32 = arith.constant 0 : i32
    %c0_i32_0 = arith.constant 0 : i32
    %c0_i32_1 = arith.constant 0 : i32
    return %c0_i32, %c0_i32_0 : i32, i32
  }
  func.func @transform_6(%arg0: i32, %arg1: i32) -> (i32, i32, i32) {
    %c0_i32 = arith.constant 0 : i32
    %c0_i32_0 = arith.constant 0 : i32
    %c0_i32_1 = arith.constant 0 : i32
    return %arg0, %c0_i32, %c0_i32_0 : i32, i32, i32
  }
  func.func @transform_7(%arg0: i32, %arg1: i32) -> (i32, i32, i32) {
    %c0_i32 = arith.constant 0 : i32
    %c0_i32_0 = arith.constant 0 : i32
    %c0_i32_1 = arith.constant 0 : i32
    return %arg1, %c0_i32, %c0_i32_0 : i32, i32, i32
  }
  func.func @transform_8(%arg0: i32, %arg1: i32) -> (i32, i32, i32) {
    %c0_i32 = arith.constant 0 : i32
    %c0_i32_0 = arith.constant 0 : i32
    %c0_i32_1 = arith.constant 0 : i32
    return %arg1, %c0_i32, %c0_i32_0 : i32, i32, i32
  }
  func.func @transform_9(%arg0: i32, %arg1: i32) -> (i32, i32, i32) {
    %c0_i32 = arith.constant 0 : i32
    %c0_i32_0 = arith.constant 0 : i32
    %c0_i32_1 = arith.constant 0 : i32
    return %arg1, %c0_i32, %c0_i32_0 : i32, i32, i32
  }
  func.func @transform_10(%arg0: i32, %arg1: i32) -> (i32, i32, i32) {
    %c0_i32 = arith.constant 0 : i32
    %c0_i32_0 = arith.constant 0 : i32
    %c0_i32_1 = arith.constant 0 : i32
    return %arg1, %c0_i32, %c0_i32_0 : i32, i32, i32
  }
  func.func @transform_11(%arg0: i32, %arg1: i32) -> (i32, i32, i32) {
    %c0_i32 = arith.constant 0 : i32
    %c0_i32_0 = arith.constant 0 : i32
    %c0_i32_1 = arith.constant 0 : i32
    return %arg1, %c0_i32, %c0_i32_0 : i32, i32, i32
  }
  func.func @transform_12(%arg0: i32, %arg1: i32) -> (i32, i32, i32) {
    %c0_i32 = arith.constant 0 : i32
    %c0_i32_0 = arith.constant 0 : i32
    %c0_i32_1 = arith.constant 0 : i32
    return %arg1, %c0_i32, %c0_i32_0 : i32, i32, i32
  }
  func.func @transform_13(%arg0: i32, %arg1: i32) -> (i32, i32, i32) {
    %c0_i32 = arith.constant 0 : i32
    %c0_i32_0 = arith.constant 0 : i32
    %c0_i32_1 = arith.constant 0 : i32
    return %arg1, %c0_i32, %c0_i32_0 : i32, i32, i32
  }
  func.func @transform_14(%arg0: i32, %arg1: i32) -> (i32, i32, i32) {
    %c0_i32 = arith.constant 0 : i32
    %c0_i32_0 = arith.constant 0 : i32
    %c0_i32_1 = arith.constant 0 : i32
    return %arg1, %c0_i32, %c0_i32_0 : i32, i32, i32
  }
  func.func @transform_15(%arg0: i32, %arg1: i32) -> (i32, i32, i32) {
    %c0_i32 = arith.constant 0 : i32
    %c0_i32_0 = arith.constant 0 : i32
    %c0_i32_1 = arith.constant 0 : i32
    return %arg1, %c0_i32, %c0_i32_0 : i32, i32, i32
  }
  func.func @transform_16(%arg0: i32, %arg1: i32) -> (i32, i32, i32) {
    %c0_i32 = arith.constant 0 : i32
    %c0_i32_0 = arith.constant 0 : i32
    %c0_i32_1 = arith.constant 0 : i32
    return %arg1, %c0_i32, %c0_i32_0 : i32, i32, i32
  }
  func.func @transform_17(%arg0: i32, %arg1: i32) -> (i32, i32, i32) {
    %c0_i32 = arith.constant 0 : i32
    %c0_i32_0 = arith.constant 0 : i32
    %c0_i32_1 = arith.constant 0 : i32
    return %arg1, %c0_i32, %c0_i32_0 : i32, i32, i32
  }
  func.func @transform_18(%arg0: i32, %arg1: i32) -> (i32, i32, i32) {
    %c0_i32 = arith.constant 0 : i32
    %c0_i32_0 = arith.constant 0 : i32
    %c0_i32_1 = arith.constant 0 : i32
    return %arg1, %c0_i32, %c0_i32_0 : i32, i32, i32
  }
  func.func @transform_19(%arg0: i32, %arg1: i32) -> (i32, i32) {
    %c0_i32 = arith.constant 0 : i32
    %c0_i32_0 = arith.constant 0 : i32
    %c0_i32_1 = arith.constant 0 : i32
    return %c0_i32, %c0_i32_0 : i32, i32
  }
  func.func @transform_20(%arg0: i32, %arg1: i32) -> (i32, i32, i32) {
    %c0_i32 = arith.constant 0 : i32
    %c0_i32_0 = arith.constant 0 : i32
    %c0_i32_1 = arith.constant 0 : i32
    return %arg0, %c0_i32, %c0_i32_0 : i32, i32, i32
  }
}

</mosaic_0001>

<bundles_post_ra>
// kernel: stroke_net_forward.1
= control target key start
LH: loop header
LB: loop body
LE: loop exit
PB: predicated region body
PF: predicated region fallthrough
CT: control target
= control target key end

     0   :  { %s5908_s0 = inlined_call_operand.vmem [shape: f32[2,9,128], index: 0, kind: input, shape index: {}]   ;;  %s5909_s1 = inlined_call_operand.vmem [shape: f32[9,128], index: 1, kind: input, shape index: {}]   ;;  %s5910_s2 = inlined_call_operand.hbm [shape: f32[128,128], index: 2, kind: input, shape index: {}]   ;;  %s5911_s3 = inlined_call_operand.hbm [shape: f32[1,128], index: 3, kind: input, shape index: {}]   ;;  %s5912_s4 = inlined_call_operand.vmem [shape: f32[128,128], index: 4, kind: input, shape index: {}]   ;;  %s5913_s5 = inlined_call_operand.hbm [shape: f32[1,128], index: 5, kind: input, shape index: {}]   ;;  %s5914_s6 = inlined_call_operand.vmem [shape: f32[2,9,9], index: 6, kind: input, shape index: {}]   ;;  %s5915_s7 = inlined_call_operand.hbm [shape: f32[2,1,128], index: 7, kind: input, shape index: {}]   ;;  %s5916_s8 = inlined_call_operand.hbm [shape: f32[2,1,128], index: 8, kind: input, shape index: {}]   ;;  %s5917_s9 = inlined_call_operand.hbm [shape: f32[2,128,384], index: 9, kind: input, shape index: {}]   ;;  %s5918_s10 = inlined_call_operand.hbm [shape: f32[2,1,384], index: 10, kind: input, shape index: {}]   ;;  %s5919_s11 = inlined_call_operand.vmem [shape: f32[2,128,128], index: 11, kind: input, shape index: {}]   ;;  %s5920_s12 = inlined_call_operand.hbm [shape: f32[2,1,128], index: 12, kind: input, shape index: {}]   ;;  %s5921_s13 = inlined_call_operand.hbm [shape: f32[2,1,128], index: 13, kind: input, shape index: {}]   ;;  %s5922_s14 = inlined_call_operand.hbm [shape: f32[2,1,128], index: 14, kind: input, shape index: {}]   ;;  %s5923_s15 = inlined_call_operand.vmem [shape: f32[2,128,128], index: 15, kind: input, shape index: {}]   ;;  %s5924_s16 = inlined_call_operand.hbm [shape: f32[2,1,128], index: 16, kind: input, shape index: {}]   ;;  %s5925_s17 = inlined_call_operand.hbm [shape: f32[2,128,128], index: 17, kind: input, shape index: {}]   ;;  %s5926_s18 = inlined_call_operand.hbm [shape: f32[2,1,128], index: 18, kind: input, shape index: {}]   ;;  %s5927_s19 = inlined_call_operand.hbm [shape: f32[128,128], index: 19, kind: input, shape index: {}]   ;;  %s5928_s20 = inlined_call_operand.vmem [shape: f32[2,9,128], index: 20, kind: output, shape index: {}]  }
   0x1   :  { %5965 = sst [smem:[#allocation45_spill]] %s5908_s0 }
   0x2   :  { %5966 = sst [smem:[#allocation46_spill]] %s5909_s1 }
   0x3   :  { %5967 = sst [smem:[#allocation47_spill]] %s5910_s2 }
   0x4   :  { %5968 = sst [smem:[#allocation48_spill]] %s5911_s3 }
   0x5   :  { %5969 = sst [smem:[#allocation49_spill]] %s5912_s4 }
   0x6   :  { %5970 = sst [smem:[#allocation50_spill]] %s5913_s5 }
   0x7   :  { %5971 = sst [smem:[#allocation51_spill]] %s5914_s6 }
   0x8   :  { %5972 = sst [smem:[#allocation52_spill]] %s5915_s7 }
   0x9   :  { %5973 = sst [smem:[#allocation53_spill]] %s5917_s9 }
   0xa   :  { %5974 = sst [smem:[#allocation54_spill]] %s5919_s11 }
   0xb   :  { %5975 = sst [smem:[#allocation55_spill]] %s5920_s12 }
   0xc   :  { %5976 = sst [smem:[#allocation56_spill]] %s5922_s14 }
   0xd   :  { %5977 = sst [smem:[#allocation57_spill]] %s5923_s15 }
   0xe   :  { %5978 = sst [smem:[#allocation58_spill]] %s5925_s17 }
   0xf   :  { %5979 = sst [smem:[#allocation59_spill]] %s5928_s20 }
  0x10   :  { %25 = vsyncpa [#allocation4], 0 }
  0x11   :  { %26 = vsyncpa [#allocation6], 0 }
  0x12   :  { %27 = vsyncpa [#allocation9], 0 }
  0x13   :  { %29 = vsyncpa [#allocation9 + $0x1], 0 }
  0x14   :  { %30 = vsyncpa [#allocation12], 0 }
  0x15   :  { %32 = vsyncpa [#allocation12 + $0x1], 0 }
  0x16   :  { %33 = vsyncpa [#allocation15], 0 }
  0x17   :  { %35 = vsyncpa [#allocation15 + $0x1], 0 }
  0x18   :  { %36 = vsyncpa [#allocation18], 0 }
  0x19   :  { %38 = vsyncpa [#allocation18 + $0x1], 0 }
  0x1a   :  { %39 = vsyncpa [#allocation21], 0 }
  0x1b   :  { %41 = vsyncpa [#allocation21 + $0x1], 0 }
  0x1c   :  { %42 = vsyncpa [#allocation24], 0  ;;  %s4952_s1 = smov 0   ;;  %s4954_s22 = smov 0  }
  0x1d   :  { %s4956_s23 = smov 0   ;;  %s4958_s24 = smov 0  }
  0x1e   :  { %s4960_s2 = smov 0   ;;  %s4962_s25 = smov 0  }
  0x1f   :  { %s4964_s3 = smov 0   ;;  %s4966_s26 = smov 0  }
  0x20 LB: > { %5980 = sst [smem:[#allocation33_spill]] %s4798_s22  ;;  %s5933_s27 = sadd.s32 4294967295, %s4822_s26   ;;  %s4822_s26 = sphi %s4966_s26, %s48_s26   ;;  %s4818_s3 = sphi %s4964_s3, %s6063_s3   ;;  %s4814_s25 = sphi %s4962_s25, %s6065_s25   ;;  %s4810_s2 = sphi %s4960_s2, %s6061_s2   ;;  %s4806_s24 = sphi %s4958_s24, %s6064_s24   ;;  %s4802_s23 = sphi %s4956_s23, %s6060_s23   ;;  %s4798_s22 = sphi %s4954_s22, %s6059_s22   ;;  %s4794_s1 = sphi %s4952_s1, %s6058_s1  }
  0x21   : > { %5981 = sst [smem:[#allocation34_spill]] %s4802_s23  ;;  %p231_p0 = scmp.ne.s32.totalorder %s4802_s23, %s4798_s22 }
  0x22   : > { %5982 = sst [smem:[#allocation35_spill]] %s4806_s24  ;;  %p232_p1 = scmp.eq.s32.totalorder %s4822_s26, 0 }
  0x23   : > { %5983 = sst [smem:[#allocation36_spill]] %s4810_s2  ;;  %p237_p2 = scmp.ne.s32.totalorder %s4798_s22, %s4794_s1 }
  0x24   : > { %5984 = sst [smem:[#allocation37_spill]] %s4818_s3  ;;  %p4998_p3 = scmp.eq.s32.totalorder %s5933_s27, 0 }
  0x25   : > { %5985 = sst [smem:[#allocation38_spill]] %s4822_s26  ;;  %p233_p4 = por %p232_p1, %p231_p0 }
  0x26   : > { %s5986_s4 = scalar_select %p4998_p3, 1, 0 }
  0x27   : > { %p3214_p5 = scmp.ge.s32.totalorder %s4822_s26, 1  ;;  %p5005_p6 = por %p4998_p3, %p237_p2 }
  0x28   : > { %5987 = sst [smem:[#allocation39_spill]] %s5986_s4  ;;  %p581_p7 = scmp.lt.s32.totalorder %s4822_s26, 5 }
  0x29   : > { %s5988_s29 = scalar_select %p5005_p6, 1, 0 }
  0x2a   : > { %p5010_p8 = pnand %p3214_p5, %p581_p7  ;;  %s4824_s0 = smov [#allocation5]  }
  0x2b   : > { %5989 = sst [smem:[#allocation40_spill]] %s5988_s29  ;;  %s610_s21 = sshll.u32 %s4824_s0, 4  ;;  %s611_s21 = int_to_ptr.vmem [resolvable:$true] %s610_s21 }
  0x2c   : > { %s5990_s30 = scalar_select %p5010_p8, 1, 0 }
  0x2d   : > { %p4101_p9 = pneg %p5010_p8  ;;  %p4149_p10 = scmp.lt.s32.totalorder %s4822_s26, 4 }
  0x2e   : > { %5991 = sst [smem:[#allocation41_spill]] %s5990_s30  ;;  %s5018_s1 = sand.u32 1, %s4802_s23  }
  0x2f   : > { %p5022_p11 = pnand %p4101_p9, %p4998_p3  ;;  %p5026_p12 = pnand %p4149_p10, %p233_p4 }
  0x30   : > { %s5994_s20 = sld [smem:[#allocation48_spill]] }
  0x31   : > { %s5992_s27 = scalar_select %p5022_p11, 1, 0 }
  0x32   : > { %s5993_s28 = scalar_select %p5026_p12, 1, 0 }
  0x33   : > { %p5038_p0 = pneg %p5022_p11 }
  0x35   : > { %s5995_s2 = scalar_select %p5038_p0, 1, 0 }
  0x36   : > { %s4316_s0 = scalar_lea.hbm %s5994_s20, 16 }
  0x37   : > { %p4317_p13 = scmp.ne.s32.totalorder %s5994_s20, %s4316_s0  ;;  %p4323_p4 = scmp.lt.u32.totalorder %s4316_s0, %s5994_s20 }
  0x39   : > { %p4319_p1 = pnand %p5038_p0, %p4317_p13 }
  0x3b   : > { %p4320_p2 = pneg %p4319_p1 }
  0x3d   : > { %p4325_p5 = pnand %p4323_p4, %p4320_p2 }
  0x3f   : > { %4328 = shalt.err (!%p4325_p5)
}
  0x40   : > { %s4329_s11 = scalar_lea.vmem %s611_s21, 16  ;;  %s4336_s6 = scalar_lea.vmem %s611_s21, 32 }
  0x41   : > { %p4330_p7 = scmp.ne.s32.totalorder %s611_s21, %s4329_s11  ;;  %p4337_p6 = scmp.lt.s32.totalorder %s611_s21, %s611_s21 }
  0x42   : > { %p4338_p3 = scmp.lt.s32.totalorder %s4336_s6, %s4329_s11 }
  0x43   : > { %p4332_p9 = pnand %p4330_p7, %p5038_p0 }
  0x44   : > { %p4339_p8 = por %p4338_p3, %p4337_p6 }
  0x45   : > { %p4333_p10 = pneg %p4332_p9 }
  0x47   : > { %p4340_p12 = pnand %p4339_p8, %p4333_p10 }
  0x49   : > { %4343 = shalt.err (!%p4340_p12)
}
  0x4a   : > { %4107 = dma.hbm_to_vmem [thread:$0]  (!%p5022_p11), %s5994_s20, 16, %s611_s21, [#allocation6]  }
  0x4b   : > { %s57_s22 = sadd.s32 1, %s4814_s25  ;;  %s60_s29 = sadd.s32 1, %s4818_s3 }
  0x4c   : > { %p58_p13 = scmp.ge.s32.totalorder %s57_s22, 2  ;;  %s5057_s0 = sand.u32 1, %s4822_s26  }
  0x4d   : > { %s5065_s6 = sshll.u32 %s4814_s25, 4  ;;  %s667_s15 = scalar_lea.vmem [#allocation8], %s5018_s1 }
  0x4e   : > { %s6067_s22 = smov (%p58_p13, %s57_s22), 0  ;;  %s6069_s29 = smov (!%p58_p13, %s60_s29), %s4818_s3 }
  0x4f   : > { %5996 = sst [smem:[#allocation42_spill]] %s6067_s22  ;;  %s221_s11 = ssub.s32 %s4814_s25, %s6067_s22 }
  0x50   : > { %p62_p3 = scmp.ge.s32.totalorder %s6069_s29, 2  ;;  %p222_p6 = scmp.eq.s32.totalorder %s221_s11, 0 }
  0x51   : > { %s674_s24 = sshll.u32 %s667_s15, 4  ;;  %s5998_s21 = sadd.s32 1, %s4802_s23  ;;  %s5081_s24 = int_to_ptr.vmem [resolvable:$true] %s674_s24 }
  0x52   : > { %s6071_s29 = smov (%p62_p3, %s6069_s29), 0  ;;  %s6000_s7 = sld [smem:[#allocation52_spill]] }
  0x53   : > { %5997 = sst [smem:[#allocation43_spill]] %s6071_s29  ;;  %p6001_p12 = scmp.ne.s32.totalorder %s5993_s28, 0 }
  0x54   : > { %s5073_s20 = scalar_select %p222_p6, %s4802_s23, %s5998_s21  }
  0x55   : > { %p5088_p1 = pneg %p6001_p12 }
  0x56   : > { %5999 = sst [smem:[#allocation44_spill]] %s5073_s20 }
  0x57   : > { %s6002_s15 = scalar_select %p5088_p1, 1, 0 }
  0x58   : > { %s5079_s30 = scalar_lea.hbm %s6000_s7, %s5065_s6  ;;  %s4349_s21 = scalar_lea.hbm %s6000_s7, 32 }
  0x59   : > { %s4344_s22 = scalar_lea.hbm %s5079_s30, 16  ;;  %p4350_p5 = scmp.lt.u32.totalorder %s5079_s30, %s6000_s7 }
  0x5a   : > { %p4345_p8 = scmp.ne.s32.totalorder %s5079_s30, %s4344_s22  ;;  %p4351_p7 = scmp.lt.u32.totalorder %s4349_s21, %s4344_s22 }
  0x5b   : > { %p4353_p10 = scmp.lt.u32.totalorder %s4344_s22, %s5079_s30 }
  0x5c   : > { %p4347_p2 = pnand %p5088_p1, %p4345_p8  ;;  %p4352_p9 = por %p4351_p7, %p4350_p5 }
  0x5e   : > { %p4348_p4 = pneg %p4347_p2  ;;  %p4354_p13 = por %p4353_p10, %p4352_p9 }
  0x60   : > { %p4355_p3 = pnand %p4354_p13, %p4348_p4 }
  0x62   : > { %4358 = shalt.err (!%p4355_p3)
}
  0x63   : > { %s4359_s11 = scalar_lea.vmem %s5081_s24, 16  ;;  %s4825_s26 = smov [#allocation8]  }
  0x64   : > { %p4360_p6 = scmp.ne.s32.totalorder %s5081_s24, %s4359_s11  ;;  %s4364_s4 = sshll.u32 %s4825_s26, 4  ;;  %s4365_s4 = int_to_ptr.vmem [resolvable:$false] %s4364_s4 }
  0x65   : > { %s4366_s3 = scalar_lea.vmem %s4365_s4, 32  ;;  %p4367_p11 = scmp.lt.s32.totalorder %s5081_s24, %s4365_s4 }
  0x66   : > { %p4362_p8 = pnand %p4360_p6, %p5088_p1  ;;  %p4368_p0 = scmp.lt.s32.totalorder %s4366_s3, %s4359_s11 }
  0x68   : > { %p4363_p2 = pneg %p4362_p8  ;;  %p4369_p5 = por %p4368_p0, %p4367_p11 }
  0x6a   : > { %p4370_p7 = pnand %p4369_p5, %p4363_p2 }
  0x6c   : > { %4373 = shalt.err (!%p4370_p7)
}
  0x6d   : > { %s6003_s22 = scalar_lea.sflag [#allocation9], %s5057_s0  ;;  %s4059_s29 = smul.u32 384, %s5018_s1 }
  0x6e   : > { %4117 = dma.hbm_to_vmem [thread:$0]  (!%p6001_p12), %s5079_s30, 16, %s5081_s24, %s6003_s22  }
  0x6f   : > { %s4060_s21 = smul.u32 6144, %s4814_s25  ;;  %s6004_s9 = sld [smem:[#allocation53_spill]] }
  0x70   : > { %s702_s4 = scalar_lea.vmem [#allocation11], %s4059_s29  ;;  %s5959_s20 = scalar_lea.sflag [#allocation12], %s5057_s0 }
  0x71   : > { %s709_s3 = sshll.u32 %s702_s4, 4  ;;  %s5120_s3 = int_to_ptr.vmem [resolvable:$true] %s709_s3 }
  0x75   : > { %s5118_s11 = scalar_lea.hbm %s6004_s9, %s4060_s21  ;;  %s4379_s7 = scalar_lea.hbm %s6004_s9, 12288 }
  0x76   : > { %s4374_s23 = scalar_lea.hbm %s5118_s11, 6144  ;;  %p4380_p9 = scmp.lt.u32.totalorder %s5118_s11, %s6004_s9 }
  0x77   : > { %p4375_p11 = scmp.ne.s32.totalorder %s5118_s11, %s4374_s23  ;;  %p4381_p10 = scmp.lt.u32.totalorder %s4379_s7, %s4374_s23 }
  0x78   : > { %p4383_p3 = scmp.lt.u32.totalorder %s4374_s23, %s5118_s11 }
  0x79   : > { %p4377_p0 = pnand %p4375_p11, %p5088_p1  ;;  %p4382_p13 = por %p4381_p10, %p4380_p9 }
  0x7b   : > { %p4378_p4 = pneg %p4377_p0  ;;  %p4384_p6 = por %p4383_p3, %p4382_p13 }
  0x7d   : > { %p4385_p8 = pnand %p4384_p6, %p4378_p4 }
  0x7f   : > { %4388 = shalt.err (!%p4385_p8)
}
  0x80   : > { %s4389_s29 = scalar_lea.vmem %s5120_s3, 6144  ;;  %s4826_s26 = smov [#allocation11]  }
  0x81   : > { %p4390_p2 = scmp.ne.s32.totalorder %s5120_s3, %s4389_s29  ;;  %s4394_s4 = sshll.u32 %s4826_s26, 4  ;;  %s4395_s4 = int_to_ptr.vmem [resolvable:$false] %s4394_s4 }
  0x82   : > { %s4396_s30 = scalar_lea.vmem %s4395_s4, 12288  ;;  %p4397_p11 = scmp.lt.s32.totalorder %s5120_s3, %s4395_s4 }
  0x83   : > { %p4392_p5 = pnand %p4390_p2, %p5088_p1  ;;  %p4398_p0 = scmp.lt.s32.totalorder %s4396_s30, %s4389_s29 }
  0x85   : > { %p4393_p7 = pneg %p4392_p5  ;;  %p4399_p9 = por %p4398_p0, %p4397_p11 }
  0x87   : > { %p4400_p10 = pnand %p4399_p9, %p4393_p7 }
  0x89   : > { %4403 = shalt.err (!%p4400_p10)
}
  0x8a   : > { %s4827_s23 = smov 384   ;;  %s4828_s24 = smov 24  }
  0x8b   : > { %4123 = dma.hbm_to_vmem [thread:$0]  (!%p6001_p12), %s5118_s11, 6144, %s5120_s3, %s5959_s20, %s4827_s23, %s4827_s23, %s4828_s24  }
  0x8c   : > { %s6005_s12 = sld [smem:[#allocation55_spill]]  ;;  %s749_s29 = scalar_lea.vmem [#allocation14], %s5018_s1 }
  0x8d   : > { %s756_s26 = sshll.u32 %s749_s29, 4  ;;  %s5957_s4 = scalar_lea.sflag [#allocation15], %s5057_s0  ;;  %s757_s26 = int_to_ptr.vmem [resolvable:$true] %s756_s26 }
  0x92   : > { %s5150_s21 = scalar_lea.hbm %s6005_s12, %s5065_s6  ;;  %s4409_s3 = scalar_lea.hbm %s6005_s12, 32 }
  0x93   : > { %s4404_s30 = scalar_lea.hbm %s5150_s21, 16  ;;  %p4410_p6 = scmp.lt.u32.totalorder %s5150_s21, %s6005_s12 }
  0x94   : > { %p4405_p4 = scmp.ne.s32.totalorder %s5150_s21, %s4404_s30  ;;  %p4411_p8 = scmp.lt.u32.totalorder %s4409_s3, %s4404_s30 }
  0x95   : > { %p4413_p5 = scmp.lt.u32.totalorder %s4404_s30, %s5150_s21 }
  0x96   : > { %p4407_p13 = pnand %p4405_p4, %p5088_p1  ;;  %p4412_p2 = por %p4411_p8, %p4410_p6 }
  0x98   : > { %p4408_p3 = pneg %p4407_p13  ;;  %p4414_p7 = por %p4413_p5, %p4412_p2 }
  0x9a   : > { %p4415_p11 = pnand %p4414_p7, %p4408_p3 }
  0x9c   : > { %4418 = shalt.err (!%p4415_p11)
}
  0x9d   : > { %s4419_s7 = scalar_lea.vmem %s757_s26, 16  ;;  %s4829_s22 = smov [#allocation14]  }
  0x9e   : > { %p4420_p0 = scmp.ne.s32.totalorder %s757_s26, %s4419_s7  ;;  %s4424_s29 = sshll.u32 %s4829_s22, 4  ;;  %s4425_s29 = int_to_ptr.vmem [resolvable:$false] %s4424_s29 }
  0x9f   : > { %s4426_s9 = scalar_lea.vmem %s4425_s29, 32  ;;  %p4427_p4 = scmp.lt.s32.totalorder %s757_s26, %s4425_s29 }
  0xa0   : > { %p4422_p9 = pnand %p4420_p0, %p5088_p1  ;;  %p4428_p13 = scmp.lt.s32.totalorder %s4426_s9, %s4419_s7 }
  0xa2   : > { %p4423_p10 = pneg %p4422_p9  ;;  %p4429_p12 = por %p4428_p13, %p4427_p4 }
  0xa4   : > { %p4430_p6 = pnand %p4429_p12, %p4423_p10 }
  0xa6   : > { %4433 = shalt.err (!%p4430_p6)
}
  0xa7   : > { %p6006_p8 = scmp.ne.s32.totalorder %s5993_s28, 0  ;;  %s6007_s14 = sld [smem:[#allocation56_spill]] }
  0xa8   : > { %s783_s23 = scalar_lea.vmem [#allocation17], %s5018_s1  ;;  %s5958_s7 = scalar_lea.sflag [#allocation18], %s5057_s0 }
  0xa9   : > { %4129 = dma.hbm_to_vmem [thread:$0]  (!%p6006_p8), %s5150_s21, 16, %s757_s26, %s5957_s4  }
  0xaa   : > { %s790_s24 = sshll.u32 %s783_s23, 4  ;;  %s791_s24 = int_to_ptr.vmem [resolvable:$true] %s790_s24 }
  0xad   : > { %s5177_s3 = scalar_lea.hbm %s6007_s14, %s5065_s6  ;;  %s4439_s26 = scalar_lea.hbm %s6007_s14, 32 }
  0xae   : > { %s4434_s22 = scalar_lea.hbm %s5177_s3, 16  ;;  %p4440_p5 = scmp.lt.u32.totalorder %s5177_s3, %s6007_s14 }
  0xaf   : > { %p4435_p12 = scmp.ne.s32.totalorder %s5177_s3, %s4434_s22  ;;  %p4441_p7 = scmp.lt.u32.totalorder %s4439_s26, %s4434_s22 }
  0xb0   : > { %p4443_p0 = scmp.lt.u32.totalorder %s4434_s22, %s5177_s3 }
  0xb1   : > { %p4437_p3 = pnand %p4435_p12, %p5088_p1  ;;  %p4442_p11 = por %p4441_p7, %p4440_p5 }
  0xb3   : > { %p4438_p2 = pneg %p4437_p3  ;;  %p4444_p9 = por %p4443_p0, %p4442_p11 }
  0xb5   : > { %p4445_p10 = pnand %p4444_p9, %p4438_p2 }
  0xb7   : > { %4448 = shalt.err (!%p4445_p10)
}
  0xb8   : > { %s4449_s11 = scalar_lea.vmem %s791_s24, 16  ;;  %s4830_s23 = smov [#allocation17]  }
  0xb9   : > { %p4450_p4 = scmp.ne.s32.totalorder %s791_s24, %s4449_s11  ;;  %s4454_s4 = sshll.u32 %s4830_s23, 4  ;;  %s4455_s4 = int_to_ptr.vmem [resolvable:$false] %s4454_s4 }
  0xba   : > { %s4456_s29 = scalar_lea.vmem %s4455_s4, 32  ;;  %p4457_p12 = scmp.lt.s32.totalorder %s791_s24, %s4455_s4 }
  0xbb   : > { %p4452_p13 = pnand %p4450_p4, %p5088_p1  ;;  %p4458_p3 = scmp.lt.s32.totalorder %s4456_s29, %s4449_s11 }
  0xbd   : > { %p4453_p6 = pneg %p4452_p13  ;;  %p4459_p8 = por %p4458_p3, %p4457_p12 }
  0xbf   : > { %p4460_p5 = pnand %p4459_p8, %p4453_p6 }
  0xc1   : > { %4463 = shalt.err (!%p4460_p5)
}
  0xc2   : > { %p6008_p7 = scmp.ne.s32.totalorder %s5993_s28, 0  ;;  %s3228_s22 = sshll.u32 %s5018_s1, 7 }
  0xc3   : > { %s3290_s21 = sshll.u32 %s4814_s25, 11  ;;  %s6009_s17 = sld [smem:[#allocation58_spill]] }
  0xc4   : > { %4135 = dma.hbm_to_vmem [thread:$0]  (!%p6008_p7), %s5177_s3, 16, %s791_s24, %s5958_s7  }
  0xc5   : > { %s826_s30 = scalar_lea.vmem [#allocation20], %s3228_s22  ;;  %s5961_s23 = scalar_lea.sflag [#allocation21], %s5057_s0 }
  0xc6   : > { %s833_s11 = sshll.u32 %s826_s30, 4  ;;  %s5207_s11 = int_to_ptr.vmem [resolvable:$true] %s833_s11 }
  0xc9   : > { %s5205_s4 = scalar_lea.hbm %s6009_s17, %s3290_s21  ;;  %s4469_s26 = scalar_lea.hbm %s6009_s17, 4096 }
  0xca   : > { %s4464_s29 = scalar_lea.hbm %s5205_s4, 2048  ;;  %p4470_p0 = scmp.lt.u32.totalorder %s5205_s4, %s6009_s17 }
  0xcb   : > { %p4465_p8 = scmp.ne.s32.totalorder %s5205_s4, %s4464_s29  ;;  %p4471_p9 = scmp.lt.u32.totalorder %s4469_s26, %s4464_s29 }
  0xcc   : > { %p4473_p4 = scmp.lt.u32.totalorder %s4464_s29, %s5205_s4 }
  0xcd   : > { %p4467_p2 = pnand %p4465_p8, %p5088_p1  ;;  %p4472_p10 = por %p4471_p9, %p4470_p0 }
  0xcf   : > { %p4468_p11 = pneg %p4467_p2  ;;  %p4474_p13 = por %p4473_p4, %p4472_p10 }
  0xd1   : > { %p4475_p6 = pnand %p4474_p13, %p4468_p11 }
  0xd3   : > { %4478 = shalt.err (!%p4475_p6)
}
  0xd4   : > { %s4479_s22 = scalar_lea.vmem %s5207_s11, 2048  ;;  %s4831_s30 = smov [#allocation20]  }
  0xd5   : > { %p4480_p12 = scmp.ne.s32.totalorder %s5207_s11, %s4479_s22  ;;  %s4484_s3 = sshll.u32 %s4831_s30, 4  ;;  %s4485_s3 = int_to_ptr.vmem [resolvable:$false] %s4484_s3 }
  0xd6   : > { %s4486_s24 = scalar_lea.vmem %s4485_s3, 4096  ;;  %p4487_p8 = scmp.lt.s32.totalorder %s5207_s11, %s4485_s3 }
  0xd7   : > { %p4482_p3 = pnand %p4480_p12, %p5088_p1  ;;  %p4488_p2 = scmp.lt.s32.totalorder %s4486_s24, %s4479_s22 }
  0xd9   : > { %p4483_p5 = pneg %p4482_p3  ;;  %p4489_p0 = por %p4488_p2, %p4487_p8 }
  0xdb   : > { %p4490_p9 = pnand %p4489_p0, %p4483_p5 }
  0xdd   : > { %4493 = shalt.err (!%p4490_p9)
}
  0xde   : > { %s5962_s29 = smov 128   ;;  %s4833_s26 = smov 8  }
  0xdf   : > { %4141 = dma.hbm_to_vmem [thread:$0]  (!%p6008_p7), %s5205_s4, 2048, %s5207_s11, %s5961_s23, %s5962_s29, %s5962_s29, %s4833_s26  }
  0xe0   : > { %s4834_s21 = smov [#allocation3]   ;;  %s4835_s30 = smov [#allocation7]  }
  0xe1   : > { %s596_s9 = sshll.u32 %s4834_s21, 4  ;;  %s624_s22 = sshll.u32 %s4835_s30, 4  ;;  %s597_s9 = int_to_ptr.vmem [resolvable:$true] %s596_s9  ;;  %s5236_s22 = int_to_ptr.vmem [resolvable:$true] %s624_s22 }
  0xe2   : > { %s6010_s7 = sld [smem:[#allocation47_spill]]  ;;  %p6011_p10 = scmp.ne.s32.totalorder %s5995_s2, 0 }
  0xe8   : > { %s4494_s20 = scalar_lea.hbm %s6010_s7, 2048 }
  0xe9   : > { %p4495_p11 = scmp.ne.s32.totalorder %s6010_s7, %s4494_s20  ;;  %p4501_p6 = scmp.lt.u32.totalorder %s4494_s20, %s6010_s7 }
  0xeb   : > { %p4497_p4 = pnand %p4495_p11, %p6011_p10 }
  0xed   : > { %p4498_p13 = pneg %p4497_p4 }
  0xef   : > { %p4503_p12 = pnand %p4501_p6, %p4498_p13 }
  0xf1   : > { %4506 = shalt.err (!%p4503_p12)
}
  0xf2   : > { %s4507_s11 = scalar_lea.vmem %s597_s9, 2048  ;;  %p4515_p2 = scmp.lt.s32.totalorder %s597_s9, %s597_s9 }
  0xf3   : > { %p4508_p3 = scmp.ne.s32.totalorder %s597_s9, %s4507_s11  ;;  %p4516_p0 = scmp.lt.s32.totalorder %s4507_s11, %s4507_s11 }
  0xf5   : > { %p4510_p5 = pnand %p4508_p3, %p6011_p10  ;;  %p4517_p9 = por %p4516_p0, %p4515_p2 }
  0xf7   : > { %p4511_p8 = pneg %p4510_p5 }
  0xf9   : > { %p4518_p7 = pnand %p4517_p9, %p4511_p8 }
  0xfb   : > { %4521 = shalt.err (!%p4518_p7)
}
  0xfc   : > { %p6012_p11 = scmp.ne.s32.totalorder %s5992_s27, 0  ;;  %s6013_s5 = sld [smem:[#allocation50_spill]] }
  0xfe   : > { %4104 = dma.hbm_to_vmem [thread:$0]  (!%p6012_p11), %s6010_s7, 2048, %s597_s9, [#allocation4], %s5962_s29, %s5962_s29, %s4833_s26  }
 0x102   : > { %s4522_s21 = scalar_lea.hbm %s6013_s5, 16 }
 0x103   : > { %p4523_p4 = scmp.ne.s32.totalorder %s6013_s5, %s4522_s21  ;;  %p4529_p6 = scmp.lt.u32.totalorder %s4522_s21, %s6013_s5 }
 0x105   : > { %p4525_p7 = pnand %p4523_p4, %p6011_p10 }
 0x107   : > { %p4526_p13 = pneg %p4525_p7 }
 0x109   : > { %p4531_p12 = pnand %p4529_p6, %p4526_p13 }
 0x10b   : > { %4534 = shalt.err (!%p4531_p12)
}
 0x10c   : > { %s4535_s9 = scalar_lea.vmem %s5236_s22, 16  ;;  %s4542_s11 = scalar_lea.vmem %s5236_s22, 32 }
 0x10d   : > { %p4536_p3 = scmp.ne.s32.totalorder %s5236_s22, %s4535_s9  ;;  %p4543_p2 = scmp.lt.s32.totalorder %s5236_s22, %s5236_s22 }
 0x10e   : > { %p4544_p0 = scmp.lt.s32.totalorder %s4542_s11, %s4535_s9 }
 0x10f   : > { %p4538_p5 = pnand %p4536_p3, %p6011_p10 }
 0x110   : > { %p4545_p9 = por %p4544_p0, %p4543_p2 }
 0x111   : > { %p4539_p8 = pneg %p4538_p5 }
 0x113   : > { %p4546_p4 = pnand %p4545_p9, %p4539_p8 }
 0x115   : > { %4549 = shalt.err (!%p4546_p4)
}
 0x116   : > { %4110 = dma.hbm_to_vmem [thread:$0]  (!%p6012_p11), %s6013_s5, 16, %s5236_s22, [#allocation6]  }
 0x117   : > { %s4836_s17 = smov [#allocation23]   ;;  %s5287_s3 = scalar_lea.hbm %s5916_s8, %s5065_s6 }
 0x118   : > { %s634_s20 = sshll.u32 %s4836_s17, 4  ;;  %s684_s24 = scalar_lea.vmem [#allocation10], %s5018_s1  ;;  %s635_s20 = int_to_ptr.vmem [resolvable:$true] %s634_s20 }
 0x119   : > { %s691_s4 = sshll.u32 %s684_s24, 4  ;;  %s4550_s23 = scalar_lea.hbm %s5927_s19, 2048  ;;  %s692_s4 = int_to_ptr.vmem [resolvable:$true] %s691_s4 }
 0x11a   : > { %p4551_p7 = scmp.ne.s32.totalorder %s5927_s19, %s4550_s23  ;;  %p4557_p12 = scmp.lt.u32.totalorder %s4550_s23, %s5927_s19 }
 0x11c   : > { %p4553_p13 = pnand %p4551_p7, %p6011_p10 }
 0x11e   : > { %p4554_p6 = pneg %p4553_p13 }
 0x120   : > { %p4559_p3 = pnand %p4557_p12, %p4554_p6 }
 0x122   : > { %4562 = shalt.err (!%p4559_p3)
}
 0x123   : > { %s4563_s17 = scalar_lea.vmem %s635_s20, 2048  ;;  %p4571_p0 = scmp.lt.s32.totalorder %s635_s20, %s635_s20 }
 0x124   : > { %p4564_p5 = scmp.ne.s32.totalorder %s635_s20, %s4563_s17  ;;  %p4572_p9 = scmp.lt.s32.totalorder %s4563_s17, %s4563_s17 }
 0x126   : > { %p4566_p8 = pnand %p4564_p5, %p6011_p10  ;;  %p4573_p4 = por %p4572_p9, %p4571_p0 }
 0x128   : > { %p4567_p2 = pneg %p4566_p8 }
 0x12a   : > { %p4574_p1 = pnand %p4573_p4, %p4567_p2 }
 0x12c   : > { %4577 = shalt.err (!%p4574_p1)
}
 0x12d   : > { %s6014_s29 = smov 128   ;;  %s4061_s2 = smul.u32 3, %s5018_s1 }
 0x12e   : > { %4113 = dma.hbm_to_vmem [thread:$0]  (!%p6012_p11), %s5927_s19, 2048, %s635_s20, [#allocation24], %s6014_s29, %s6014_s29, %s4833_s26  }
 0x12f   : > { %s4578_s30 = scalar_lea.hbm %s5287_s3, 16  ;;  %p6015_p1 = scmp.ne.s32.totalorder %s6002_s15, 0 }
 0x130   : > { %p4579_p10 = scmp.ne.s32.totalorder %s5287_s3, %s4578_s30  ;;  %s4583_s9 = scalar_lea.hbm %s5916_s8, 32 }
 0x131   : > { %p4584_p6 = scmp.lt.u32.totalorder %s5287_s3, %s5916_s8  ;;  %p4585_p12 = scmp.lt.u32.totalorder %s4583_s9, %s4578_s30 }
 0x132   : > { %p4581_p7 = pnand %p4579_p10, %p6015_p1  ;;  %p4587_p5 = scmp.lt.u32.totalorder %s4578_s30, %s5287_s3 }
 0x133   : > { %p4586_p3 = por %p4585_p12, %p4584_p6 }
 0x134   : > { %p4582_p13 = pneg %p4581_p7 }
 0x135   : > { %p4588_p8 = por %p4587_p5, %p4586_p3 }
 0x137   : > { %p4589_p11 = pnand %p4588_p8, %p4582_p13 }
 0x139   : > { %4592 = shalt.err (!%p4589_p11)
}
 0x13a   : > { %s4593_s26 = scalar_lea.vmem %s692_s4, 16  ;;  %s4837_s20 = smov [#allocation10]  }
 0x13b   : > { %p4594_p2 = scmp.ne.s32.totalorder %s692_s4, %s4593_s26  ;;  %s4598_s22 = sshll.u32 %s4837_s20, 4  ;;  %s4599_s22 = int_to_ptr.vmem [resolvable:$false] %s4598_s22 }
 0x13c   : > { %s4600_s14 = scalar_lea.vmem %s4599_s22, 32  ;;  %p4601_p4 = scmp.lt.s32.totalorder %s692_s4, %s4599_s22 }
 0x13d   : > { %p4596_p0 = pnand %p4594_p2, %p6015_p1  ;;  %p4602_p10 = scmp.lt.s32.totalorder %s4600_s14, %s4593_s26 }
 0x13f   : > { %p4597_p9 = pneg %p4596_p0  ;;  %p4603_p7 = por %p4602_p10, %p4601_p4 }
 0x141   : > { %p4604_p6 = pnand %p4603_p7, %p4597_p9 }
 0x143   : > { %4607 = shalt.err (!%p4604_p6)
}
 0x144   : > { %p6016_p12 = scmp.ne.s32.totalorder %s5993_s28, 0  ;;  %s6017_s17 = scalar_lea.sflag [#allocation9], %s5057_s0 }
 0x145   : > { %s4062_s29 = smul.u32 48, %s4814_s25  ;;  %s723_s21 = scalar_lea.vmem [#allocation13], %s4061_s2 }
 0x146   : > { %4120 = dma.hbm_to_vmem [thread:$0]  (!%p6016_p12), %s5287_s3, 16, %s692_s4, %s6017_s17  }
 0x147   : > { %s731_s23 = sshll.u32 %s723_s21, 4  ;;  %s729_s24 = scalar_lea.hbm %s5918_s10, %s4062_s29  ;;  %s732_s23 = int_to_ptr.vmem [resolvable:$true] %s731_s23 }
 0x148   : > { %s4608_s9 = scalar_lea.hbm %s729_s24, 48  ;;  %s4613_s26 = scalar_lea.hbm %s5918_s10, 96 }
 0x149   : > { %p4609_p13 = scmp.ne.s32.totalorder %s729_s24, %s4608_s9  ;;  %p4614_p8 = scmp.lt.u32.totalorder %s729_s24, %s5918_s10 }
 0x14a   : > { %p4615_p11 = scmp.lt.u32.totalorder %s4613_s26, %s4608_s9  ;;  %p4617_p0 = scmp.lt.u32.totalorder %s4608_s9, %s729_s24 }
 0x14b   : > { %p4611_p3 = pnand %p4609_p13, %p6015_p1 }
 0x14c   : > { %p4616_p2 = por %p4615_p11, %p4614_p8 }
 0x14d   : > { %p4612_p5 = pneg %p4611_p3 }
 0x14e   : > { %p4618_p9 = por %p4617_p0, %p4616_p2 }
 0x150   : > { %p4619_p4 = pnand %p4618_p9, %p4612_p5 }
 0x152   : > { %4622 = shalt.err (!%p4619_p4)
}
 0x153   : > { %s4623_s3 = scalar_lea.vmem %s732_s23, 48  ;;  %s4838_s4 = smov [#allocation13]  }
 0x154   : > { %p4624_p10 = scmp.ne.s32.totalorder %s732_s23, %s4623_s3  ;;  %s4628_s2 = sshll.u32 %s4838_s4, 4  ;;  %s4629_s2 = int_to_ptr.vmem [resolvable:$false] %s4628_s2 }
 0x155   : > { %s4630_s14 = scalar_lea.vmem %s4629_s2, 96  ;;  %p4631_p13 = scmp.lt.s32.totalorder %s732_s23, %s4629_s2 }
 0x156   : > { %p4626_p7 = pnand %p4624_p10, %p6015_p1  ;;  %p4632_p3 = scmp.lt.s32.totalorder %s4630_s14, %s4623_s3 }
 0x158   : > { %p4627_p6 = pneg %p4626_p7  ;;  %p4633_p12 = por %p4632_p3, %p4631_p13 }
 0x15a   : > { %p4634_p8 = pnand %p4633_p12, %p4627_p6 }
 0x15c   : > { %4637 = shalt.err (!%p4634_p8)
}
 0x15d   : > { %p6018_p11 = scmp.ne.s32.totalorder %s5993_s28, 0  ;;  %s6019_s17 = scalar_lea.sflag [#allocation12], %s5057_s0 }
 0x15e   : > { %s5353_s30 = scalar_lea.hbm %s5921_s13, %s5065_s6  ;;  %s766_s27 = scalar_lea.vmem [#allocation16], %s5018_s1 }
 0x15f   : > { %4126 = dma.hbm_to_vmem [thread:$0]  (!%p6018_p11), %s729_s24, 48, %s732_s23, %s6019_s17  }
 0x160   : > { %s773_s9 = sshll.u32 %s766_s27, 4  ;;  %s4638_s11 = scalar_lea.hbm %s5353_s30, 16  ;;  %s774_s9 = int_to_ptr.vmem [resolvable:$true] %s773_s9 }
 0x161   : > { %p4639_p12 = scmp.ne.s32.totalorder %s5353_s30, %s4638_s11  ;;  %s4643_s23 = scalar_lea.hbm %s5921_s13, 32 }
 0x162   : > { %p4644_p0 = scmp.lt.u32.totalorder %s5353_s30, %s5921_s13  ;;  %p4645_p9 = scmp.lt.u32.totalorder %s4643_s23, %s4638_s11 }
 0x163   : > { %p4641_p5 = pnand %p4639_p12, %p6015_p1  ;;  %p4647_p10 = scmp.lt.u32.totalorder %s4638_s11, %s5353_s30 }
 0x164   : > { %p4646_p4 = por %p4645_p9, %p4644_p0 }
 0x165   : > { %p4642_p2 = pneg %p4641_p5 }
 0x166   : > { %p4648_p7 = por %p4647_p10, %p4646_p4 }
 0x168   : > { %p4649_p6 = pnand %p4648_p7, %p4642_p2 }
 0x16a   : > { %4652 = shalt.err (!%p4649_p6)
}
 0x16b   : > { %s4653_s22 = scalar_lea.vmem %s774_s9, 16  ;;  %s4839_s3 = smov [#allocation16]  }
 0x16c   : > { %p4654_p13 = scmp.ne.s32.totalorder %s774_s9, %s4653_s22  ;;  %s4658_s4 = sshll.u32 %s4839_s3, 4  ;;  %s4659_s4 = int_to_ptr.vmem [resolvable:$false] %s4658_s4 }
 0x16d   : > { %s4660_s2 = scalar_lea.vmem %s4659_s4, 32  ;;  %p4661_p12 = scmp.lt.s32.totalorder %s774_s9, %s4659_s4 }
 0x16e   : > { %p4656_p3 = pnand %p4654_p13, %p6015_p1  ;;  %p4662_p5 = scmp.lt.s32.totalorder %s4660_s2, %s4653_s22 }
 0x170   : > { %p4657_p8 = pneg %p4656_p3  ;;  %p4663_p11 = por %p4662_p5, %p4661_p12 }
 0x172   : > { %p4664_p0 = pnand %p4663_p11, %p4657_p8 }
 0x174   : > { %4667 = shalt.err (!%p4664_p0)
}
 0x175   : > { %p6020_p9 = scmp.ne.s32.totalorder %s5993_s28, 0  ;;  %s6021_s14 = scalar_lea.sflag [#allocation15], %s5057_s0 }
 0x176   : > { %s5379_s21 = scalar_lea.hbm %s5924_s16, %s5065_s6  ;;  %s808_s27 = scalar_lea.vmem [#allocation19], %s5018_s1 }
 0x177   : > { %4132 = dma.hbm_to_vmem [thread:$0]  (!%p6020_p9), %s5353_s30, 16, %s774_s9, %s6021_s14  }
 0x178   : > { %s815_s11 = sshll.u32 %s808_s27, 4  ;;  %s4668_s12 = scalar_lea.hbm %s5379_s21, 16  ;;  %s816_s11 = int_to_ptr.vmem [resolvable:$true] %s815_s11 }
 0x179   : > { %p4669_p11 = scmp.ne.s32.totalorder %s5379_s21, %s4668_s12  ;;  %s4673_s30 = scalar_lea.hbm %s5924_s16, 32 }
 0x17a   : > { %p4674_p10 = scmp.lt.u32.totalorder %s5379_s21, %s5924_s16  ;;  %p4675_p7 = scmp.lt.u32.totalorder %s4673_s30, %s4668_s12 }
 0x17b   : > { %p4671_p2 = pnand %p4669_p11, %p6015_p1  ;;  %p4677_p13 = scmp.lt.u32.totalorder %s4668_s12, %s5379_s21 }
 0x17c   : > { %p4676_p6 = por %p4675_p7, %p4674_p10 }
 0x17d   : > { %p4672_p4 = pneg %p4671_p2 }
 0x17e   : > { %p4678_p3 = por %p4677_p13, %p4676_p6 }
 0x180   : > { %p4679_p8 = pnand %p4678_p3, %p4672_p4 }
 0x182   : > { %4682 = shalt.err (!%p4679_p8)
}
 0x183   : > { %s4683_s20 = scalar_lea.vmem %s816_s11, 16  ;;  %s4840_s22 = smov [#allocation19]  }
 0x184   : > { %p4684_p12 = scmp.ne.s32.totalorder %s816_s11, %s4683_s20  ;;  %s4688_s3 = sshll.u32 %s4840_s22, 4  ;;  %s4689_s3 = int_to_ptr.vmem [resolvable:$false] %s4688_s3 }
 0x185   : > { %s4690_s4 = scalar_lea.vmem %s4689_s3, 32  ;;  %p4691_p11 = scmp.lt.s32.totalorder %s816_s11, %s4689_s3 }
 0x186   : > { %p4686_p5 = pnand %p4684_p12, %p6015_p1  ;;  %p4692_p2 = scmp.lt.s32.totalorder %s4690_s4, %s4683_s20 }
 0x188   : > { %p4687_p0 = pneg %p4686_p5  ;;  %p4693_p9 = por %p4692_p2, %p4691_p11 }
 0x18a   : > { %p4694_p7 = pnand %p4693_p9, %p4687_p0 }
 0x18c   : > { %4697 = shalt.err (!%p4694_p7)
}
 0x18d   : > { %p6022_p10 = scmp.ne.s32.totalorder %s5993_s28, 0  ;;  %s6023_s2 = scalar_lea.sflag [#allocation18], %s5057_s0 }
 0x18e   : > { %s5405_s29 = scalar_lea.hbm %s5926_s18, %s5065_s6  ;;  %s846_s27 = scalar_lea.vmem [#allocation22], %s5018_s1 }
 0x18f   : > { %4138 = dma.hbm_to_vmem [thread:$0]  (!%p6022_p10), %s5379_s21, 16, %s816_s11, %s6023_s2  }
 0x190   : > { %s853_s12 = sshll.u32 %s846_s27, 4  ;;  %s4698_s26 = scalar_lea.hbm %s5405_s29, 16  ;;  %s854_s12 = int_to_ptr.vmem [resolvable:$true] %s853_s12 }
 0x191   : > { %p4699_p9 = scmp.ne.s32.totalorder %s5405_s29, %s4698_s26  ;;  %s4703_s21 = scalar_lea.hbm %s5926_s18, 32 }
 0x192   : > { %p4704_p13 = scmp.lt.u32.totalorder %s5405_s29, %s5926_s18  ;;  %p4705_p3 = scmp.lt.u32.totalorder %s4703_s21, %s4698_s26 }
 0x193   : > { %p4701_p4 = pnand %p4699_p9, %p6015_p1  ;;  %p4707_p12 = scmp.lt.u32.totalorder %s4698_s26, %s5405_s29 }
 0x194   : > { %p4706_p8 = por %p4705_p3, %p4704_p13 }
 0x195   : > { %p4702_p6 = pneg %p4701_p4 }
 0x196   : > { %p4708_p5 = por %p4707_p12, %p4706_p8 }
 0x198   : > { %p4709_p0 = pnand %p4708_p5, %p4702_p6 }
 0x19a   : > { %4712 = shalt.err (!%p4709_p0)
}
 0x19b   : > { %s4713_s1 = scalar_lea.vmem %s854_s12, 16  ;;  %s4841_s6 = smov [#allocation22]  }
 0x19c   : > { %p4714_p11 = scmp.ne.s32.totalorder %s854_s12, %s4713_s1  ;;  %s4718_s24 = sshll.u32 %s4841_s6, 4  ;;  %s4719_s24 = int_to_ptr.vmem [resolvable:$false] %s4718_s24 }
 0x19d   : > { %s4720_s20 = scalar_lea.vmem %s4719_s24, 32  ;;  %p4721_p9 = scmp.lt.s32.totalorder %s854_s12, %s4719_s24 }
 0x19e   : > { %p4716_p2 = pnand %p4714_p11, %p6015_p1  ;;  %p4722_p4 = scmp.lt.s32.totalorder %s4720_s20, %s4713_s1 }
 0x1a0   : > { %p4717_p7 = pneg %p4716_p2  ;;  %p4723_p10 = por %p4722_p4, %p4721_p9 }
 0x1a2   : > { %p4724_p3 = pnand %p4723_p10, %p4717_p7 }
 0x1a4   : > { %4727 = shalt.err (!%p4724_p3)
}
 0x1a5   : > { %p6024_p13 = scmp.ne.s32.totalorder %s5993_s28, 0  ;;  %s6025_s22 = scalar_lea.sflag [#allocation21], %s5057_s0 }
 0x1a6   : > { %s6026_s3 = sld [smem:[#allocation41_spill]] }
 0x1a7   : > { %4144 = dma.hbm_to_vmem [thread:$0]  (!%p6024_p13), %s5405_s29, 16, %s854_s12, %s6025_s22  }
 0x1ac   : > { %p6027_p6 = scmp.ne.s32.totalorder %s6026_s3, 0 }
 0x1ad   : > { %s6028_s15 = sld [smem:[#allocation39_spill]] (!%p6027_p6) }
 0x1ae   : > { %862 = sbr.rel (%p6027_p6) target bundleno = 4668 (0x123c), region = 100 }
 0x1b3   : > { %p6029_p1 = scmp.ne.s32.totalorder (!%p6027_p6), %s6028_s15, 0 }
 0x1b5   : > { %4761 = dma.done.wait (%p6029_p1), [#allocation4], 2048  }
 0x1b6   : > { %4763 = vsyncadd (%p6029_p1), [#allocation4], 4294965248 }
 0x1b7   : > { %4765 = dma.done.wait (%p6029_p1), [#allocation6], 32  }
 0x1b8   : > { %4767 = vsyncadd (%p6029_p1), [#allocation6], 4294967264  ;;  %s6030_s28 = sld [smem:[#allocation38_spill]]  ;;  %s6032_s0 = sld [smem:[#allocation33_spill]] }
 0x1b9   : > { %s6033_s2 = sld [smem:[#allocation40_spill]] }
 0x1be   : > { %s6031_s4 = sadd.s32 4294967295, %s6030_s28   ;;  %s5440_s17 = sand.u32 1, %s6032_s0  }
 0x1bf   : > { %s876_s14 = sand.u32 1, %s6031_s4   ;;  %p6034_p10 = scmp.ne.s32.totalorder %s6033_s2, 0 }
 0x1c0   : > { %s877_s29 = scalar_lea.sflag [#allocation9], %s876_s14 }
 0x1c1   : > { %4769 = dma.done.wait (%p6034_p10), %s877_s29, 32  }
 0x1c2   : > { %4771 = vsyncadd (%p6034_p10), %s877_s29, 4294967264  ;;  %s4063_s12 = smul.u32 384, %s5440_s17  ;;  %s893_s23 = scalar_lea.sflag [#allocation12], %s876_s14 }
 0x1c4   : > { %s5449_s30 = scalar_lea.vmem [#allocation11], %s4063_s12 }
 0x1c5   : > { %4773 = dma.done.wait (%p6034_p10), %s893_s23, 6192  }
 0x1c6   : > { %4775 = vsyncadd (%p6034_p10), %s893_s23, 4294961104  ;;  %s4064_s21 = smul.u32 3, %s5440_s17  ;;  %s911_s9 = scalar_lea.sflag [#allocation15], %s876_s14 }
 0x1c8   : > { %s5456_s11 = scalar_lea.vmem [#allocation13], %s4064_s21 }
 0x1c9   : > { %4777 = dma.done.wait (%p6034_p10), %s911_s9, 32  }
 0x1ca   : > { %4779 = vsyncadd (%p6034_p10), %s911_s9, 4294967264  ;;  %s927_s24 = scalar_lea.sflag [#allocation18], %s876_s14 }
 0x1cb   : > { %4781 = dma.done.wait (%p6034_p10), %s927_s24, 32  }
 0x1cc   : > { %4783 = vsyncadd (%p6034_p10), %s927_s24, 4294967264  ;;  %s3236_s22 = sshll.u32 %s5440_s17, 7  ;;  %s943_s28 = scalar_lea.sflag [#allocation21], %s876_s14 }
 0x1cd   : > { %s5471_s4 = scalar_lea.vmem [#allocation20], %s3236_s22 }
 0x1ce   : > { %4785 = dma.done.wait (%p6034_p10), %s943_s28, 2064  }
 0x1cf   : > { %4787 = vsyncadd (%p6034_p10), %s943_s28, 4294965232 }
 0x1d0   : > { %4789 = dma.done.wait (%p6029_p1), [#allocation24], 2048  }
 0x1d1   : > { %4791 = vsyncadd (%p6029_p1), [#allocation24], 4294965248  ;;  %s6035_s29 = sld [smem:[#allocation36_spill]]  ;;  %s6036_s12 = sld [smem:[#allocation35_spill]]  ;;  %v1098_v0 = vlaneseq  ;;  %v4842_v2 = vmov 0.0  }
 0x1d2   : > { %s6037_s9 = sld [smem:[#allocation45_spill]]  ;;  %s6038_s28 = sld [smem:[#allocation51_spill]] }
 0x1d3   : > { %v1099_v1 = vand.u32 127, %v1098_v0  ;;  %s6039_s1 = sld [smem:[#allocation59_spill]]  ;;  %s6040_s23 = sld [smem:[#allocation54_spill]] }
 0x1d4   : > { %s6041_s15 = sld [smem:[#allocation57_spill]] }
 0x1d5   : > { %vm1100_vm0 = vcmp.lt.s32.totalorder %v1099_v1, 96 }
 0x1d6   : > { %v5498_v3 = vsel %vm1100_vm0, 1.0, %v4842_v2 }
 0x1d7   : > { %p1073_p8 = scmp.lt.s32.totalorder %s6035_s29, 1  ;;  %p1083_p12 = scmp.lt.s32.totalorder %s6036_s12, 1 }
 0x1d8   : > { %p3249_p5 = scmp.ne.s32.totalorder %s6036_s12, 0 }
 0x1d9   : > { %s6073_s29 = smov (!%p1073_p8, %s6035_s29), 1  ;;  %v1109_v4 = vld [vmem:[#allocation3] sm:$0xff] (!%p3249_p5)  ;;  %v1110_v5 = vld [vmem:[#allocation3 + $0x8] sm:$0xff] (!%p3249_p5)  ;;  %v1111_v6 = vld [vmem:[#allocation3 + $0x10] sm:$0xff] (!%p3249_p5)  ;;  %s6042_s26 = sld [smem:[#allocation49_spill]] (!%p3249_p5) }
 0x1da   : > { %s1084_s2 = scalar_select %p1083_p12, %s6036_s12, 1 }
 0x1db   : > { %s3291_s14 = sshll.u32 %s6073_s29, 4  ;;  %1106 = sbr.rel (%p3249_p5) target bundleno = 949 (0x3b5), region = 160  ;;  %v3755_v7 = vpack.c.bf16 (!%p3249_p5), %v1110_v5, %v1109_v4  ;;  %v1112_v8 = vld [vmem:[#allocation3 + $0x18] sm:$0xff] (!%p3249_p5)  ;;  %v1113_v10 = vld [vmem:[#allocation3 + $0x20] sm:$0xff] (!%p3249_p5)  ;;  %v1114_v11 = vld [vmem:[#allocation3 + $0x28] sm:$0xff] (!%p3249_p5) }
 0x1dc   : > { %s5490_s24 = scalar_lea.vmem %s6037_s9, %s3291_s14  ;;  %s5495_s0 = scalar_lea.vmem %s6038_s28, %s3291_s14  ;;  %v3759_v9 = vpack.c.bf16 (!%p3249_p5), %v1112_v8, %v1111_v6  ;;  %v3763_v12 = vpack.c.bf16 (!%p3249_p5), %v1114_v11, %v1113_v10  ;;  %v1115_v13 = vld [vmem:[#allocation3 + $0x30] sm:$0xff] (!%p3249_p5)  ;;  %v1116_v14 = vld [vmem:[#allocation3 + $0x38] sm:$0xff] (!%p3249_p5)  ;;  %v1117_v25 = vld [vmem:[#allocation3 + $0x40] sm:$0xff] (!%p3249_p5) }
 0x1dd   : > { %s3293_s3 = sshll.u32 %s1084_s2, 7  ;;  %s5503_s29 = scalar_lea.vmem %s6039_s1, %s3291_s14  ;;  %3756 = vmatprep.subr.bf16.mxu0 (!%p3249_p5), %v3755_v7  ;;  %v1107_v15 = vld [vmem:[%s5490_s24] sm:$0xff] (!%p3249_p5)  ;;  %v3767_v24 = vpack.c.bf16 (!%p3249_p5), %v1116_v14, %v1115_v13  ;;  %v1118_v26 = vld [vmem:[#allocation3 + $0x48] sm:$0xff] (!%p3249_p5)  ;;  %v1120_v32 = vld [vmem:[#allocation3 + $0x58] sm:$0xff] (!%p3249_p5) }
 0x1de   : > { %s5508_s21 = scalar_lea.vmem %s6040_s23, %s3293_s3  ;;  %s5513_s22 = scalar_lea.vmem %s6041_s15, %s3293_s3  ;;  %3758 = vmatpush3.bf16.msra.mxu0 (!%p3249_p5), %v3755_v7  ;;  %3486 = vmatprep.mubr.f32.mxu0 (!%p3249_p5), %v1107_v15  ;;  %v3771_v30 = vpack.c.bf16 (!%p3249_p5), %v1118_v26, %v1117_v25  ;;  %v1119_v31 = vld [vmem:[#allocation3 + $0x50] sm:$0xff] (!%p3249_p5)  ;;  %v1121_v37 = vld [vmem:[#allocation3 + $0x60] sm:$0xff] (!%p3249_p5)  ;;  %v1122_v38 = vld [vmem:[#allocation3 + $0x68] sm:$0xff] (!%p3249_p5) }
 0x1df   : > { %3760 = vmatprep.subr.bf16.mxu0 (!%p3249_p5), %v3759_v9  ;;  %s6043_s6 = smov (!%p3249_p5), %s6042_s26  ;;  %v1209_v16 = vld [vmem:[%s6042_s26] sm:$0xff] (!%p3249_p5)  ;;  %v3775_v36 = vpack.c.bf16 (!%p3249_p5), %v1120_v32, %v1119_v31  ;;  %v3779_v42 = vpack.c.bf16 (!%p3249_p5), %v1122_v38, %v1121_v37  ;;  %v1124_v44 = vld [vmem:[#allocation3 + $0x78] sm:$0xff] (!%p3249_p5)  ;;  %v3250_v54 = vld [vmem:[#allocation5] ss:$0 sm:$0xff] (!%p3249_p5)  ;;  %s6044_s14 = sld [smem:[#allocation46_spill]] (!%p3249_p5) }
 0x1e0   : > { %v1210_v17 = vld [vmem:[%s6043_s6 + $0x8] sm:$0xff] (!%p3249_p5)  ;;  %v1211_v18 = vld [vmem:[%s6043_s6 + $0x10] sm:$0xff] (!%p3249_p5)  ;;  %v1212_v20 = vld [vmem:[%s6043_s6 + $0x18] sm:$0xff] (!%p3249_p5) }
 0x1e1   : > { %v3787_v19 = vpack.c.bf16 (!%p3249_p5), %v1210_v17, %v1209_v16  ;;  %v3791_v21 = vpack.c.bf16 (!%p3249_p5), %v1212_v20, %v1211_v18  ;;  %v1213_v22 = vld [vmem:[%s6043_s6 + $0x20] sm:$0xff] (!%p3249_p5)  ;;  %v1214_v23 = vld [vmem:[%s6043_s6 + $0x28] sm:$0xff] (!%p3249_p5)  ;;  %v1215_v28 = vld [vmem:[%s6043_s6 + $0x30] sm:$0xff] (!%p3249_p5) }
 0x1e2   : > { %3762 = vmatpush3.bf16.msra.mxu0 %v3759_v9  ;;  %v3795_v27 = vpack.c.bf16 %v1214_v23, %v1213_v22  ;;  %v1216_v29 = vld [vmem:[%s6043_s6 + $0x38] sm:$0xff]  ;;  %v1217_v34 = vld [vmem:[%s6043_s6 + $0x40] sm:$0xff]  ;;  %v1218_v35 = vld [vmem:[%s6043_s6 + $0x48] sm:$0xff] }
 0x1e3   : > { %3764 = vmatprep.subr.bf16.mxu0 %v3763_v12  ;;  %3788 = vmatprep.subr.bf16.mxu1 %v3787_v19  ;;  %v3799_v33 = vpack.c.bf16 %v1216_v29, %v1215_v28  ;;  %v3803_v39 = vpack.c.bf16 %v1218_v35, %v1217_v34  ;;  %v1219_v40 = vld [vmem:[%s6043_s6 + $0x50] sm:$0xff]  ;;  %v1220_v41 = vld [vmem:[%s6043_s6 + $0x58] sm:$0xff]  ;;  %v1123_v43 = vld [vmem:[#allocation3 + $0x70] sm:$0xff] }
 0x1e4   : > { %3790 = vmatpush3.bf16.msra.mxu1 %v3787_v19  ;;  %v3807_v45 = vpack.c.bf16 %v1220_v41, %v1219_v40  ;;  %v1221_v46 = vld [vmem:[%s6043_s6 + $0x60] sm:$0xff]  ;;  %v1222_v47 = vld [vmem:[%s6043_s6 + $0x68] sm:$0xff]  ;;  %v3783_v48 = vpack.c.bf16 %v1124_v44, %v1123_v43  ;;  %v1223_v51 = vld [vmem:[%s6043_s6 + $0x70] sm:$0xff] }
 0x1e5   : > { %3792 = vmatprep.subr.bf16.mxu1 %v3791_v21  ;;  %v3811_v49 = vpack.c.bf16 %v1222_v47, %v1221_v46  ;;  %v1108_v50 = vld [vmem:[%s5490_s24 + $0x8] sm:$0x1]  ;;  %v1224_v52 = vld [vmem:[%s6043_s6 + $0x78] sm:$0xff]  ;;  %v3251_v61 = vld [vmem:[#allocation7] ss:$0 sm:$0xff] }
 0x1e6   : > { %3766 = vmatpush3.bf16.msra.mxu0 %v3763_v12  ;;  %v3815_v53 = vpack.c.bf16 %v1224_v52, %v1223_v51  ;;  %v1312_v6 = vld [vmem:[%s6044_s14 + $0x8] sm:$0x1]  ;;  %v1311_v9 = vld [vmem:[%s6044_s14] sm:$0xff] }
 0x1e7   : > { %3768 = vmatprep.subr.bf16.mxu0 %v3767_v24 }
 0x1e8   : > { %3794 = vmatpush3.bf16.msra.mxu1 %v3791_v21 }
 0x1e9   : > { %3796 = vmatprep.subr.bf16.mxu1 %v3795_v27 }
 0x1ea   : > { %3770 = vmatpush3.bf16.msra.mxu0 %v3767_v24 }
 0x1eb   : > { %3772 = vmatprep.subr.bf16.mxu0 %v3771_v30 }
 0x1ec   : > { %3798 = vmatpush3.bf16.msra.mxu1 %v3795_v27 }
 0x1ed   : > { %3800 = vmatprep.subr.bf16.mxu1 %v3799_v33 }
 0x1ee   : > { %3774 = vmatpush3.bf16.msra.mxu0 %v3771_v30 }
 0x1ef   : > { %3776 = vmatprep.subr.bf16.mxu0 %v3775_v36 }
 0x1f0   : > { %3802 = vmatpush3.bf16.msra.mxu1 %v3799_v33 }
 0x1f1   : > { %3804 = vmatprep.subr.bf16.mxu1 %v3803_v39 }
 0x1f2   : > { %3778 = vmatpush3.bf16.msra.mxu0 %v3775_v36 }
 0x1f3   : > { %3780 = vmatprep.subr.bf16.mxu0 %v3779_v42 }
 0x1f4   : > { %3806 = vmatpush3.bf16.msra.mxu1 %v3803_v39 }
 0x1f5   : > { %3808 = vmatprep.subr.bf16.mxu1 %v3807_v45 }
 0x1f6   : > { %3782 = vmatpush3.bf16.msra.mxu0 %v3779_v42 }
 0x1f7   : > { %3784 = vmatprep.subr.bf16.mxu0 %v3783_v48 }
 0x1f8   : > { %3810 = vmatpush3.bf16.msra.mxu1 %v3807_v45 }
 0x1f9   : > { %3812 = vmatprep.subr.bf16.mxu1 %v3811_v49 }
 0x1fa   : > { %3786 = vmatpush3.bf16.msra.mxu0 %v3783_v48 }
 0x1fc   : > { %3814 = vmatpush3.bf16.msra.mxu1 %v3811_v49 }
 0x1fd   : > { %3487 = vmatmul.mubr.f32.vlgmr.msra.gmra.mrb[0].mxu0 %v1108_v50  ;;  %3816 = vmatprep.subr.bf16.mxu1 %v3815_v53 }
 0x200   : > { %3818 = vmatpush3.bf16.msra.mxu1 %v3815_v53 }
 0x2d0   : > { %v3488_v55 = vpop.f32.mrb[0].mxu0 }
 0x2d1   : > { %v1204_v56 = vadd.f32 %v3488_v55, %v3250_v54  ;;  %v1198_v57 = vpop.f32.mrb[1].mxu0 }
 0x2d2   : > { %v1199_v58 = vadd.f32 %v3250_v54, %v1198_v57 }
 0x2d3   : > { %v1208_v60 = vmax.f32 %v1204_v56, 0.0 }
 0x2d4   : > { %v1207_v59 = vmax.f32 %v1199_v58, 0.0 }
 0x2d6   : > { %3521 = vmatprep.mubr.f32.mxu1 %v1207_v59 }
 0x2d7   : > { %3522 = vmatmul.mubr.f32.vlgmr.msra.gmra.mrb[0].mxu1 %v1208_v60 }
 0x3aa   : > { %v3523_v62 = vpop.f32.mrb[0].mxu1 }
 0x3ab   : > { %v1304_v63 = vadd.f32 %v3523_v62, %v3251_v61  ;;  %v1298_v1 = vpop.f32.mrb[1].mxu1 }
 0x3ac   : > { %v1299_v4 = vadd.f32 %v3251_v61, %v1298_v1 }
 0x3ad   : > { %v1308_v5 = vmax.f32 %v1304_v63, 0.0 }
 0x3ae   : > { %v1307_v7 = vmax.f32 %v1299_v4, 0.0 }
 0x3af   : > { %v1310_v8 = vmul.f32 9.797959, %v1308_v5 }
 0x3b0   : > { %v1309_v10 = vmul.f32 9.797959, %v1307_v7 }
 0x3b1   : > { %v1314_v11 = vadd.f32 %v1312_v6, %v1310_v8 }
 0x3b2   : > { %v1313_v12 = vadd.f32 %v1311_v9, %v1309_v10 }
 0x3b3   : > { %1316 = vst [vmem:[#allocation2 + $0x8] sm:$0x1] %v1314_v11 }
 0x3b4   : > { %1315 = vst [vmem:[#allocation2] sm:$0xff] %v1313_v12 }
 0x3b5 PF: > { %vm1323_vm1 = vcmask 1040384   ;;  %1493 = vmatprep.mubr.f32.mxu0 %v4842_v2  ;;  %v1365_v16 = vld [vmem:[%s5449_s30 + $0x8] sm:$0xff]  ;;  %v1368_v17 = vld [vmem:[%s5449_s30 + $0x20] sm:$0xff]  ;;  %v1367_v20 = vld [vmem:[%s5449_s30 + $0x18] sm:$0xff]  ;;  %s6045_s9 = scalar_lea.vmem [#allocation8], %s5440_s17  ;;  %vm1583_vm2 = vcmask 261120  }
 0x3b6   : > { %v1364_v18 = vld [vmem:[%s5449_s30] sm:$0xff]  ;;  %v3819_v19 = vpack.c.bf16 %v1368_v17, %v1365_v16  ;;  %v1371_v21 = vld [vmem:[%s5449_s30 + $0x38] sm:$0xff]  ;;  %v1374_v22 = vld [vmem:[%s5449_s30 + $0x50] sm:$0xff]  ;;  %vm4843_vm4 = vmmov 1   ;;  %vm1679_vm6 = vcmask 65536   ;;  %vm1675_vm7 = vcmask 72704  }
 0x3b7   : > { %v3821_v23 = vpack.c.bf16 %v1367_v20, %v1364_v18  ;;  %v3823_v24 = vpack.c.bf16 %v1374_v22, %v1371_v21  ;;  %v1370_v25 = vld [vmem:[%s5449_s30 + $0x30] sm:$0xff]  ;;  %v1373_v26 = vld [vmem:[%s5449_s30 + $0x48] sm:$0xff]  ;;  %v1380_v30 = vld [vmem:[%s5449_s30 + $0x80] sm:$0xff]  ;;  %s4846_s15 = smov 32   ;;  %vm2425_vm8 = vcmask 523264   ;;  %vm2428_vm9 = vcmask 785408  }
 0x3b8   : > { %v1366_v27 = vld [vmem:[%s5449_s30 + $0x10] sm:$0xff]  ;;  %3820 = vmatprep.subr.bf16.mxu0 %v3819_v19  ;;  %v1369_v28 = vld [vmem:[%s5449_s30 + $0x28] sm:$0xff]  ;;  %v3825_v31 = vpack.c.bf16 %v1373_v26, %v1370_v25  ;;  %v1372_v33 = vld [vmem:[%s5449_s30 + $0x40] sm:$0xff]  ;;  %s6053_s5 = scalar_lea.vmem [#allocation17], %s5440_s17  ;;  %s6054_s27 = scalar_lea.vmem [#allocation19], %s5440_s17 }
 0x3b9   : > { %v1377_v29 = vld [vmem:[%s5449_s30 + $0x68] sm:$0xff]  ;;  %3822 = vmatpush1.bf16.msra.mxu0 %v3821_v23  ;;  %v3851_v32 = vpack.c.bf16 %v1369_v28, %v1366_v27  ;;  %v1376_v35 = vld [vmem:[%s5449_s30 + $0x60] sm:$0xff]  ;;  %v1379_v36 = vld [vmem:[%s5449_s30 + $0x78] sm:$0xff]  ;;  %s6055_s26 = scalar_lea.vmem [#allocation22], %s5440_s17 }
 0x3ba   : > { %v5574_v14 = vld [vmem:[#allocation2 + $0x8] sm:$0x1]  ;;  %3824 = vmatprep.subr.bf16.mxu0 %v3823_v24  ;;  %v3827_v34 = vpack.c.bf16 %v1380_v30, %v1377_v29  ;;  %v1375_v37 = vld [vmem:[%s5449_s30 + $0x58] sm:$0xff]  ;;  %v3829_v39 = vpack.c.bf16 %v1379_v36, %v1376_v35  ;;  %v1385_v55 = vld [vmem:[%s5449_s30 + $0xa8] sm:$0xff] }
 0x3bb   : > { %v5572_v13 = vld [vmem:[#allocation2] sm:$0xff]  ;;  %v1324_v15 = vsel %vm1323_vm1, %v5574_v14, 0.0  ;;  %3852 = vmatprep.subr.bf16.mxu1 %v3851_v32  ;;  %v3855_v38 = vpack.c.bf16 %v1375_v37, %v1372_v33  ;;  %v1383_v51 = vld [vmem:[%s5449_s30 + $0x98] sm:$0xff]  ;;  %v1386_v52 = vld [vmem:[%s5449_s30 + $0xb0] sm:$0xff] }
 0x3bc   : > { %1321 = vadd.xlane.f32.xlu0 %v5572_v13  ;;  %3854 = vmatpush3.bf16.msra.mxu1 %v3851_v32  ;;  %v3831_v53 = vpack.c.bf16 %v1386_v52, %v1383_v51  ;;  %v1382_v54 = vld [vmem:[%s5449_s30 + $0x90] sm:$0xff]  ;;  %v1381_v58 = vld [vmem:[%s5449_s30 + $0x88] sm:$0xff]  ;;  %v1392_v61 = vld [vmem:[%s5449_s30 + $0xe0] sm:$0xff] }
 0x3bd   : > { %3826 = vmatpush1.bf16.msra.mxu0 %v3825_v31  ;;  %3856 = vmatprep.subr.bf16.mxu1 %v3855_v38  ;;  %v1378_v56 = vld [vmem:[%s5449_s30 + $0x70] sm:$0xff]  ;;  %v3833_v57 = vpack.c.bf16 %v1385_v55, %v1382_v54  ;;  %v1389_v60 = vld [vmem:[%s5449_s30 + $0xc8] sm:$0xff]  ;;  %v1388_v63 = vld [vmem:[%s5449_s30 + $0xc0] sm:$0xff] }
 0x3be   : > { %3828 = vmatprep.subr.bf16.mxu0 %v3827_v34  ;;  %v3859_v59 = vpack.c.bf16 %v1381_v58, %v1378_v56  ;;  %v3835_v62 = vpack.c.bf16 %v1392_v61, %v1389_v60  ;;  %v1391_v1 = vld [vmem:[%s5449_s30 + $0xd8] sm:$0xff]  ;;  %v1384_v4 = vld [vmem:[%s5449_s30 + $0xa0] sm:$0xff]  ;;  %v1398_v9 = vld [vmem:[%s5449_s30 + $0x110] sm:$0xff]  ;;  %v1415_v58 = vshrl.u32 %v1098_v0, 7 }
 0x3bf   : > { %v3837_v5 = vpack.c.bf16 %v1391_v1, %v1388_v63  ;;  %v1387_v6 = vld [vmem:[%s5449_s30 + $0xb8] sm:$0xff]  ;;  %v1394_v11 = vld [vmem:[%s5449_s30 + $0xf0] sm:$0xff]  ;;  %v1397_v12 = vld [vmem:[%s5449_s30 + $0x108] sm:$0xff] }
 0x3c0   : > { %1325 = vadd.xlane.f32.xlu0 %v1324_v15  ;;  %3858 = vmatpush3.bf16.msra.mxu1 %v3855_v38  ;;  %v3863_v7 = vpack.c.bf16 %v1387_v6, %v1384_v4  ;;  %v1395_v8 = vld [vmem:[%s5449_s30 + $0xf8] sm:$0xff]  ;;  %v1390_v15 = vld [vmem:[%s5449_s30 + $0xd0] sm:$0xff]  ;;  %v3841_v16 = vpack.c.bf16 %v1397_v12, %v1394_v11  ;;  %v1393_v17 = vld [vmem:[%s5449_s30 + $0xe8] sm:$0xff]  ;;  %v1424_v61 = vsub.s32 2, %v1415_v58 }
 0x3c1   : > { %3830 = vmatpush1.bf16.msra.mxu0 %v3829_v39  ;;  %3860 = vmatprep.subr.bf16.mxu1 %v3859_v59  ;;  %v3839_v10 = vpack.c.bf16 %v1398_v9, %v1395_v8  ;;  %v3867_v18 = vpack.c.bf16 %v1393_v17, %v1390_v15  ;;  %v1401_v19 = vld [vmem:[%s5449_s30 + $0x128] sm:$0xff]  ;;  %v1404_v20 = vld [vmem:[%s5449_s30 + $0x140] sm:$0xff]  ;;  %v1403_v23 = vld [vmem:[%s5449_s30 + $0x138] sm:$0xff] }
 0x3c2   : > { %3832 = vmatprep.subr.bf16.mxu0 %v3831_v53  ;;  %v1400_v21 = vld [vmem:[%s5449_s30 + $0x120] sm:$0xff]  ;;  %v3843_v22 = vpack.c.bf16 %v1404_v20, %v1401_v19  ;;  %v1399_v25 = vld [vmem:[%s5449_s30 + $0x118] sm:$0xff]  ;;  %v1410_v29 = vld [vmem:[%s5449_s30 + $0x170] sm:$0xff] }
 0x3c3   : > { %v1396_v24 = vld [vmem:[%s5449_s30 + $0x100] sm:$0xff]  ;;  %v3845_v26 = vpack.c.bf16 %v1403_v23, %v1400_v21  ;;  %v1407_v28 = vld [vmem:[%s5449_s30 + $0x158] sm:$0xff]  ;;  %v1406_v30 = vld [vmem:[%s5449_s30 + $0x150] sm:$0xff] }
 0x3c4   : > { %3862 = vmatpush3.bf16.msra.mxu1 %v3859_v59  ;;  %v3871_v27 = vpack.c.bf16 %v1399_v25, %v1396_v24  ;;  %v3847_v31 = vpack.c.bf16 %v1410_v29, %v1407_v28  ;;  %v1409_v32 = vld [vmem:[%s5449_s30 + $0x168] sm:$0xff]  ;;  %v1402_v33 = vld [vmem:[%s5449_s30 + $0x130] sm:$0xff]  ;;  %v1408_v37 = vld [vmem:[%s5449_s30 + $0x160] sm:$0xff]  ;;  %v1416_v59 = vsub.s32 0, %v1415_v58 }
 0x3c5   : > { %3834 = vmatpush1.bf16.msra.mxu0 %v3833_v57  ;;  %3864 = vmatprep.subr.bf16.mxu1 %v3863_v7  ;;  %v1405_v34 = vld [vmem:[%s5449_s30 + $0x148] sm:$0xff]  ;;  %v3849_v36 = vpack.c.bf16 %v1409_v32, %v1406_v30  ;;  %v1411_v38 = vld [vmem:[%s5449_s30 + $0x178] sm:$0xff]  ;;  %s6046_s30 = scalar_lea.vmem [#allocation10], %s5440_s17  ;;  %v1412_v60 = vld [vmem:[%s5456_s11] sm:$0x7]  ;;  %s4844_s11 = smov 64  }
 0x3c6   : > { %3836 = vmatprep.subr.bf16.mxu0 %v3835_v62  ;;  %v3875_v35 = vpack.c.bf16 %v1405_v34, %v1402_v33  ;;  %v3879_v39 = vpack.c.bf16 %v1411_v38, %v1408_v37  ;;  %v3253_v51 = vld [vmem:[%s6046_s30] ss:$0 sm:$0xff]  ;;  %v1420_v62 = vsub.s32 1, %v1415_v58  ;;  %v1425_v4 = vrot.slane %v1412_v60, %v1424_v61  ;;  %vm5656_vm3 = vmpackc.low %vm1583_vm2, %vm1583_vm2 }
 0x3c7   : > { %vm5663_vm5 = vmpackc.low %vm1323_vm1, %vm4843_vm4  ;;  %v5685_v25 = vld [vmem:[%s5495_s0] sm:$0xff] }
 0x3c8   : > { %3866 = vmatpush3.bf16.msra.mxu1 %v3863_v7 }
 0x3c9   : > { %3838 = vmatpush1.bf16.msra.mxu0 %v3837_v5  ;;  %3868 = vmatprep.subr.bf16.mxu1 %v3867_v18  ;;  %v1421_v5 = vrot.slane %v1412_v60, %v1420_v62 }
 0x3ca   : > { %3840 = vmatprep.subr.bf16.mxu0 %v3839_v10 }
 0x3cc   : > { %3870 = vmatpush3.bf16.msra.mxu1 %v3867_v18  ;;  %v2436_v18 = vld [vmem:[%s5508_s21 + $0x28] sm:$0xff] }
 0x3cd   : > { %3842 = vmatpush1.bf16.msra.mxu0 %v3841_v16  ;;  %3872 = vmatprep.subr.bf16.mxu1 %v3871_v27 }
 0x3ce   : > { %3844 = vmatprep.subr.bf16.mxu0 %v3843_v22  ;;  %v5682_v22 = vld [vmem:[%s5495_s0 + $0x8] sm:$0x1]  ;;  %s4845_s0 = smov 96  }
 0x3d0   : > { %3874 = vmatpush3.bf16.msra.mxu1 %v3871_v27 }
 0x3d1   : > { %3846 = vmatpush1.bf16.msra.mxu0 %v3845_v26  ;;  %3876 = vmatprep.subr.bf16.mxu1 %v3875_v35 }
 0x3d2   : > { %3848 = vmatprep.subr.bf16.mxu0 %v3847_v31 }
 0x3d4   : > { %3878 = vmatpush3.bf16.msra.mxu1 %v3875_v35 }
 0x3d5   : > { %3850 = vmatpush1.bf16.msra.mxu0 %v3849_v36  ;;  %3880 = vmatprep.subr.bf16.mxu1 %v3879_v39 }
 0x3d8   : > { %3882 = vmatpush3.bf16.msra.mxu1 %v3879_v39 }
 0x449   : > { %v1322_v40 = vpop.xlane.xlu0 %1321 }
 0x44a   : > { %v1327_v41 = vmul.f32 0.010416667, %v1322_v40 }
 0x44c   : > { %v1329_v42 = vsub.f32 %v5572_v13, %v1327_v41 }
 0x44d   : > { %v1326_v43 = vpop.xlane.xlu0 %1325 }
 0x44e   : > { %v1328_v44 = vmul.f32 0.010416667, %v1326_v43  ;;  %v5598_v45 = vmul.f32 %v5498_v3, %v1329_v42 }
 0x450   : > { %v1330_v46 = vsub.f32 %v5574_v14, %v1328_v44  ;;  %v1333_v47 = vmul.f32 %v5598_v45, %v5598_v45 }
 0x452   : > { %v5604_v48 = vmul.f32 %v5498_v3, %v1330_v46  ;;  %1335 = vadd.xlane.f32.xlu1 %v1333_v47 }
 0x454   : > { %v1334_v49 = vmul.f32 %v5604_v48, %v5604_v48 }
 0x456   : > { %v1337_v50 = vsel %vm1323_vm1, %v1334_v49, 0.0  ;;  %v3252_v49 = vld [vmem:[%s6045_s9] ss:$0 sm:$0xff] }
 0x457   : > { %1338 = vadd.xlane.f32.xlu1 %v1337_v50 }
 0x4df   : > { %v1336_v40 = vpop.xlane.xlu1 %1335 }
 0x4e0   : > { %v1340_v41 = vmul.f32 0.010416667, %v1336_v40 }
 0x4e2   : > { %v1342_v42 = vadd.f32 1e-05, %v1340_v41 }
 0x4e4   : > { %4276 = vrsqrt.f32 %v1342_v42  ;;  %v1339_v43 = vpop.xlane.xlu1 %1338 }
 0x4e5   : > { %v1341_v44 = vmul.f32 0.010416667, %v1339_v43 }
 0x4e7   : > { %v1343_v46 = vadd.f32 1e-05, %v1341_v44 }
 0x4e9   : > { %4278 = vrsqrt.f32 %v1343_v46 }
 0x4ee   : > { %v4277_v47 = vpop.eup %4276 }
 0x4ef   : > { %v1346_v50 = vmul.f32 %v4277_v47, %v5598_v45  ;;  %v1417_v45 = vrot.slane %v1412_v60, %v1416_v59 }
 0x4f1   : > { %v1354_v52 = vmul.f32 %v3252_v49, %v1346_v50 }
 0x4f3   : > { %v4279_v53 = vpop.eup %4278  ;;  %v1362_v54 = vadd.f32 %v3253_v51, %v1354_v52 }
 0x4f4   : > { %v1347_v55 = vmul.f32 %v4279_v53, %v5604_v48 }
 0x4f5   : > { %1494 = vmatmul.mubr.f32.vlgmr.msra.gmra.mrb[0].mxu0 %v1362_v54  ;;  %3556 = vmatprep.mubr.f32.mxu1 %v1362_v54 }
 0x4f6   : > { %1499 = vmatprep.mubr.f32.mxu0 %v4842_v2  ;;  %v1355_v56 = vmul.f32 %v3252_v49, %v1347_v55 }
 0x4f8   : > { %v1363_v57 = vadd.f32 %v3253_v51, %v1355_v56 }
 0x4fa   : > { %1500 = vmatmul.mubr.f32.gmra.mrb[2].mxu0 %v1363_v57  ;;  %3557 = vmatmul.mubr.f32.vlgmr.msra.gmra.mrb[0].mxu1 %v1363_v57 }
 0x5c8   : > { %v1495_v63 = vpop.f32.mrb[0].mxu0 }
 0x5c9   : > { %v5650_v1 = vadd.f32 %v1495_v63, %v1417_v45  ;;  %v1497_v48 = vpop.f32.mrb[1].mxu0 }
 0x5ca   : > { %v1498_v9 = vadd.f32 %v1497_v48, %v1421_v5 }
 0x5cb   : > { %3563 = vmatprep.mubr.msk.f32.mxu1 %vm1583_vm2, %v5650_v1 }
 0x5cd   : > { %v1501_v2 = vpop.f32.mrb[2].mxu0  ;;  %v3558_v6 = vpop.f32.mrb[0].mxu1 }
 0x5ce   : > { %v1578_v7 = vadd.f32 %v3558_v6, %v1425_v4  ;;  %v1503_v8 = vpop.f32.mrb[3].mxu0  ;;  %v1572_v0 = vpop.f32.mrb[1].mxu1  ;;  %v5675_v20 = vadd.f32 %v1501_v2, %v1417_v45 }
 0x5cf   : > { %v1504_v10 = vadd.f32 %v1503_v8, %v1421_v5  ;;  %v1573_v11 = vadd.f32 %v1572_v0, %v1425_v4 }
 0x5d1   : > { %v3883_v15 = vpack.c.bf16 %v1504_v10, %v1498_v9  ;;  %v3889_v16 = vpack.c.bf16 %v1578_v7, %v1573_v11  ;;  %v5660_v17 = vpack.i.bf16 %v1504_v10, %v1498_v9  ;;  %v5667_v19 = vpack.i.bf16 %v1578_v7, %v1573_v11 }
 0x5d3   : > { %3885 = vmatprep.subr.msk.bf16.mxu1 %vm5656_vm3, %v3883_v15 }
 0x5d4   : > { %3888 = vmatpush3.bf16.xpose.msk.msra.mxu1 %vm5656_vm3, %v3883_v15 }
 0x5d5   : > { %3891 = vmatprep.subr.msk.bf16.mxu1 %vm5663_vm5, %v3889_v16 }
 0x5db   : > { %3564 = vmatmul.mubr.msk.f32.vlgmr.msra.gmra.mrb[2].mxu1 %vm1583_vm2, %v5675_v20 }
 0x5dc   : > { %3894 = vmatpush3.bf16.msk.msra.mxu1 %vm5663_vm5, %v3889_v16 }
 0x6ae   : > { %v3565_v21 = vpop.f32.mrb[2].mxu1 }
 0x6af   : > { %v1672_v23 = vmul.f32 0.20412415, %v3565_v21  ;;  %v1662_v24 = vpop.f32.mrb[3].mxu1 }
 0x6b0   : > { %v1671_v26 = vmul.f32 0.20412415, %v1662_v24 }
 0x6b1   : > { %v1674_v27 = vadd.f32 %v1672_v23, %v5682_v22 }
 0x6b2   : > { %v1673_v28 = vadd.f32 %v1671_v26, %v5685_v25 }
 0x6b3   : > { %v1680_v29 = vsel %vm1679_vm6, %v1674_v27, -inf }
 0x6b4   : > { %1681 = vmax.xlane.f32.xlu1 %v1680_v29  ;;  %v1676_v30 = vsel %vm1675_vm7, %v1673_v28, -inf }
 0x6b5   : > { %1677 = vmax.xlane.f32.xlu0 %v1676_v30 }
 0x741   : > { %v1682_v31 = vpop.xlane.xlu1 %1681 }
 0x742   : > { %v1684_v32 = vsub.f32 %v1674_v27, %v1682_v31  ;;  %v1678_v33 = vpop.xlane.xlu0 %1677 }
 0x743   : > { %v1683_v34 = vsub.f32 %v1673_v28, %v1678_v33 }
 0x744   : > { %v1687_v35 = vmul.f32 1.442695, %v1684_v32 }
 0x745   : > { %v1685_v36 = vmul.f32 1.442695, %v1683_v34 }
 0x746   : > { %4280 = vpow2.f32 %v1687_v35 }
 0x747   : > { %4282 = vpow2.f32 %v1685_v36 }
 0x750   : > { %v4281_v37 = vpop.eup %4280 }
 0x751   : > { %v4283_v38 = vpop.eup %4282  ;;  %v1692_v39 = vsel %vm1679_vm6, %v4281_v37, 0.0 }
 0x752   : > { %1693 = vadd.xlane.f32.xlu1 %v1692_v39  ;;  %v1689_v40 = vsel %vm1675_vm7, %v4283_v38, 0.0 }
 0x753   : > { %1690 = vadd.xlane.f32.xlu0 %v1689_v40 }
 0x763   : > { %4237 = vrot.lane.b32.xlu1 %v5660_v17, %s4844_s11 }
 0x767   : > { %1783 = vrot.lane.b32.xlu1 %v5650_v1, %s4845_s0 }
 0x769   : > { %4232 = vrot.lane.b32.xlu0 %v5660_v17, %s4845_s0 }
 0x76b   : > { %1785 = vrot.lane.b32.xlu1 %v5675_v20, %s4845_s0 }
 0x76d   : > { %1989 = vrot.lane.b32.xlu0 %v5650_v1, %s4844_s11 }
 0x76f   : > { %1991 = vrot.lane.b32.xlu1 %v5675_v20, %s4844_s11 }
 0x7df   : > { %v1694_v41 = vpop.xlane.xlu1 %1693 }
 0x7e0   : > { %4284 = vrcp.f32 %v1694_v41  ;;  %v1691_v42 = vpop.xlane.xlu0 %1690 }
 0x7e1   : > { %4286 = vrcp.f32 %v1691_v42 }
 0x7e3   : > { %v4238_v49 = vpop.permute.xlu1 %4237 }
 0x7e4   : > { %v4233_v43 = vpop.permute.xlu0 %4232  ;;  %v4240_v52 = vunpack.i.h.bf16 %v4238_v49  ;;  %v4239_v53 = vunpack.i.l.bf16 %v4238_v49 }
 0x7e5   : > { %v4235_v44 = vunpack.i.h.bf16 %v4233_v43  ;;  %v4234_v46 = vunpack.i.l.bf16 %v4233_v43 }
 0x7e6   : > { %v3907_v56 = vpack.c.bf16 %v4240_v52, %v4239_v53 }
 0x7e7   : > { %v3895_v47 = vpack.c.bf16 %v4235_v44, %v4234_v46  ;;  %v1784_v57 = vpop.permute.xlu1 %1783 }
 0x7e8   : > { %v1990_v59 = vpop.permute.xlu0 %1989 }
 0x7e9   : > { %3897 = vmatprep.subr.msk.bf16.mxu1 %vm5656_vm3, %v3895_v47 }
 0x7ea   : > { %v4285_v50 = vpop.eup %4284 }
 0x7eb   : > { %v4287_v51 = vpop.eup %4286  ;;  %v1698_v55 = vmul.f32 %v4285_v50, %v4281_v37  ;;  %v1786_v58 = vpop.permute.xlu1 %1785 }
 0x7ec   : > { %v1697_v54 = vmul.f32 %v4287_v51, %v4283_v38 }
 0x7ee   : > { %3570 = vmatprep.mubr.msk.f32.mxu1 %vm1675_vm7, %v1697_v54 }
 0x7ef   : > { %3571 = vmatmul.mubr.msk.f32.vlgmr.msra.gmra.mrb[4].mxu1 %vm1675_vm7, %v1698_v55  ;;  %v1992_v60 = vpop.permute.xlu1 %1991 }
 0x7f0   : > { %3900 = vmatpush3.bf16.xpose.msk.msra.mxu1 %vm5656_vm3, %v3895_v47  ;;  %3577 = vmatprep.mubr.msk.f32.mxu1 %vm1583_vm2, %v1784_v57 }
 0x7f1   : > { %3909 = vmatprep.subr.msk.bf16.mxu1 %vm5656_vm3, %v3907_v56 }
 0x7f7   : > { %3578 = vmatmul.mubr.msk.f32.vlgmr.msra.gmra.mrb[6].mxu1 %vm1583_vm2, %v1786_v58 }
 0x7f8   : > { %3912 = vmatpush3.bf16.xpose.msk.msra.mxu1 %vm5656_vm3, %v3907_v56  ;;  %3591 = vmatprep.mubr.msk.f32.mxu1 %vm1583_vm2, %v1990_v59 }
 0x7ff   : > { %3592 = vmatmul.mubr.msk.f32.vlgmr.msra.gmra.mrb[8].mxu1 %vm1583_vm2, %v1992_v60 }
 0x8c2   : > { %v5719_v45 = vpop.f32.mrb[4].mxu1 }
 0x8c3   : > { %v5721_v61 = vpop.f32.mrb[5].mxu1 }
 0x8ca   : > { %v3579_v62 = vpop.f32.mrb[6].mxu1 }
 0x8cb   : > { %v1865_v63 = vpop.f32.mrb[7].mxu1  ;;  %v1875_v9 = vmul.f32 0.20412415, %v3579_v62 }
 0x8cc   : > { %v1874_v34 = vmul.f32 0.20412415, %v1865_v63 }
 0x8cd   : > { %v1877_v10 = vadd.f32 %v1875_v9, %v5682_v22 }
 0x8ce   : > { %v1876_v35 = vadd.f32 %v1874_v34, %v5685_v25 }
 0x8cf   : > { %v1881_v11 = vsel %vm1679_vm6, %v1877_v10, -inf }
 0x8d0   : > { %v1878_v36 = vsel %vm1675_vm7, %v1876_v35, -inf }
 0x8d2   : > { %v3593_v48 = vpop.f32.mrb[8].mxu1 }
 0x8d3   : > { %v2081_v4 = vmul.f32 0.20412415, %v3593_v48  ;;  %v2071_v5 = vpop.f32.mrb[9].mxu1 }
 0x8d4   : > { %v2080_v2 = vmul.f32 0.20412415, %v2071_v5 }
 0x8d5   : > { %v2083_v6 = vadd.f32 %v2081_v4, %v5682_v22 }
 0x8d6   : > { %v2082_v7 = vadd.f32 %v2080_v2, %v5685_v25 }
 0x8d7   : > { %v2087_v8 = vsel %vm1679_vm6, %v2083_v6, -inf }
 0x8d8   : > { %2088 = vmax.xlane.f32.xlu1 %v2087_v8  ;;  %v2084_v0 = vsel %vm1675_vm7, %v2082_v7, -inf }
 0x8d9   : > { %2085 = vmax.xlane.f32.xlu0 %v2084_v0 }
 0x8e9   : > { %4247 = vrot.lane.b32.xlu1 %v5660_v17, %s4846_s15 }
 0x8ed   : > { %2194 = vrot.lane.b32.xlu1 %v5650_v1, %s4846_s15 }
 0x8f1   : > { %2196 = vrot.lane.b32.xlu1 %v5675_v20, %s4846_s15 }
 0x915   : > { %1882 = vmax.xlane.f32.xlu1 %v1881_v11 }
 0x965   : > { %v2089_v15 = vpop.xlane.xlu1 %2088 }
 0x966   : > { %v2091_v16 = vsub.f32 %v2083_v6, %v2089_v15  ;;  %v2086_v21 = vpop.xlane.xlu0 %2085 }
 0x967   : > { %v2090_v23 = vsub.f32 %v2082_v7, %v2086_v21 }
 0x968   : > { %v2094_v24 = vmul.f32 1.442695, %v2091_v16 }
 0x969   : > { %v2092_v26 = vmul.f32 1.442695, %v2090_v23  ;;  %v4248_v28 = vpop.permute.xlu1 %4247 }
 0x96a   : > { %4288 = vpow2.f32 %v2094_v24  ;;  %v4250_v42 = vunpack.i.h.bf16 %v4248_v28  ;;  %v4249_v43 = vunpack.i.l.bf16 %v4248_v28 }
 0x96b   : > { %4290 = vpow2.f32 %v2092_v26 }
 0x96c   : > { %v3919_v49 = vpack.c.bf16 %v4250_v42, %v4249_v43  ;;  %v2433_v42 = vld [vmem:[%s5508_s21 + $0x10] sm:$0xff] }
 0x96d   : > { %v2195_v29 = vpop.permute.xlu1 %2194 }
 0x971   : > { %v2197_v30 = vpop.permute.xlu1 %2196 }
 0x974   : > { %v4289_v17 = vpop.eup %4288 }
 0x975   : > { %v2099_v1 = vsel %vm1679_vm6, %v4289_v17, 0.0  ;;  %v4291_v27 = vpop.eup %4290 }
 0x976   : > { %2100 = vadd.xlane.f32.xlu0 %v2099_v1  ;;  %v2096_v20 = vsel %vm1675_vm7, %v4291_v27, 0.0 }
 0x97a   : > { %2097 = vadd.xlane.f32.xlu0 %v2096_v20 }
 0x990   : > { %4242 = vrot.lane.b32.xlu0 %v5667_v19, %s4844_s11 }
 0x9a2   : > { %v1883_v31 = vpop.xlane.xlu1 %1882 }
 0x9a3   : > { %v1885_v32 = vsub.f32 %v1877_v10, %v1883_v31 }
 0x9a5   : > { %v1888_v33 = vmul.f32 1.442695, %v1885_v32 }
 0x9a7   : > { %4292 = vpow2.f32 %v1888_v33 }
 0x9af   : > { %1879 = vmax.xlane.f32.xlu0 %v1878_v36 }
 0x9b1   : > { %v5741_v37 = vpop.eup %4292 }
 0x9b2   : > { %v1893_v38 = vsel %vm1679_vm6, %v5741_v37, 0.0 }
 0x9b3   : > { %1894 = vadd.xlane.f32.xlu1 %v1893_v38 }
 0xa03   : > { %v2101_v39 = vpop.xlane.xlu0 %2100 }
 0xa04   : > { %4294 = vrcp.f32 %v2101_v39 }
 0xa07   : > { %v2098_v40 = vpop.xlane.xlu0 %2097 }
 0xa08   : > { %4296 = vrcp.f32 %v2098_v40 }
 0xa0b   : > { %v4243_v41 = vpop.permute.xlu0 %4242 }
 0xa0c   : > { %v4245_v44 = vunpack.i.h.bf16 %v4243_v41  ;;  %v4244_v46 = vunpack.i.l.bf16 %v4243_v41  ;;  %v2432_v41 = vld [vmem:[%s5508_s21 + $0x8] sm:$0xff] }
 0xa0e   : > { %v3913_v47 = vpack.c.bf16 %v4245_v44, %v4244_v46  ;;  %v4295_v50 = vpop.eup %4294  ;;  %v2434_v44 = vld [vmem:[%s5508_s21 + $0x18] sm:$0xff] }
 0xa0f   : > { %v2105_v53 = vmul.f32 %v4295_v50, %v4289_v17  ;;  %v3935_v46 = vpack.c.bf16 %v2434_v44, %v2433_v42  ;;  %v2437_v50 = vld [vmem:[%s5508_s21 + $0x30] sm:$0xff] }
 0xa10   : > { %3915 = vmatprep.subr.msk.bf16.mxu1 %vm5663_vm5, %v3913_v47 }
 0xa11   : > { %3918 = vmatpush3.bf16.msk.msra.mxu1 %vm5663_vm5, %v3913_v47  ;;  %v2435_v47 = vld [vmem:[%s5508_s21 + $0x20] sm:$0xff] }
 0xa12   : > { %v4297_v51 = vpop.eup %4296  ;;  %3921 = vmatprep.subr.msk.bf16.mxu1 %vm5656_vm3, %v3919_v49 }
 0xa13   : > { %v2104_v52 = vmul.f32 %v4297_v51, %v4291_v27  ;;  %v2438_v51 = vld [vmem:[%s5508_s21 + $0x38] sm:$0xff] }
 0xa15   : > { %3598 = vmatprep.mubr.msk.f32.mxu1 %vm1675_vm7, %v2104_v52  ;;  %v3943_v52 = vpack.c.bf16 %v2438_v51, %v2437_v50  ;;  %v2581_v50 = vld [vmem:[%s5513_s22 + $0x30] sm:$0xff]  ;;  %v2582_v51 = vld [vmem:[%s5513_s22 + $0x38] sm:$0xff] }
 0xa16   : > { %3599 = vmatmul.mubr.msk.f32.vlgmr.msra.gmra.mrb[10].mxu1 %vm1675_vm7, %v2105_v53  ;;  %v2439_v53 = vld [vmem:[%s5508_s21 + $0x40] sm:$0xff] }
 0xa17   : > { %3605 = vmatprep.mubr.msk.f32.mxu1 %vm1583_vm2, %v2195_v29 }
 0xa1a   : > { %3924 = vmatpush3.bf16.xpose.msk.msra.mxu1 %vm5656_vm3, %v3919_v49  ;;  %v3939_v49 = vpack.c.bf16 %v2436_v18, %v2435_v47  ;;  %v2579_v18 = vld [vmem:[%s5513_s22 + $0x20] sm:$0xff] }
 0xa21   : > { %3606 = vmatmul.mubr.msk.f32.vlgmr.msra.gmra.mrb[12].mxu1 %vm1583_vm2, %v2197_v30 }
 0xa3c   : > { %v1880_v55 = vpop.xlane.xlu0 %1879 }
 0xa3d   : > { %v1884_v58 = vsub.f32 %v1876_v35, %v1880_v55  ;;  %v2440_v55 = vld [vmem:[%s5508_s21 + $0x48] sm:$0xff] }
 0xa3f   : > { %v1886_v59 = vmul.f32 1.442695, %v1884_v58  ;;  %v3947_v58 = vpack.c.bf16 %v2440_v55, %v2439_v53  ;;  %v2583_v53 = vld [vmem:[%s5513_s22 + $0x40] sm:$0xff]  ;;  %v2584_v55 = vld [vmem:[%s5513_s22 + $0x48] sm:$0xff] }
 0xa40   : > { %v1895_v17 = vpop.xlane.xlu1 %1894 }
 0xa41   : > { %4298 = vpow2.f32 %v1886_v59  ;;  %v2441_v59 = vld [vmem:[%s5508_s21 + $0x50] sm:$0xff] }
 0xa4b   : > { %v4299_v6 = vpop.eup %4298 }
 0xa4c   : > { %v1890_v7 = vsel %vm1675_vm7, %v4299_v6, 0.0 }
 0xae9   : > { %v5757_v54 = vpop.f32.mrb[10].mxu1 }
 0xaea   : > { %v5759_v56 = vpop.f32.mrb[11].mxu1 }
 0xaeb   : > { %v4266_v57 = vpack.i.bf16 %v5757_v54, %v5759_v56 }
 0xaf4   : > { %v3607_v60 = vpop.f32.mrb[12].mxu1 }
 0xaf5   : > { %v2276_v62 = vpop.f32.mrb[13].mxu1  ;;  %v2286_v63 = vmul.f32 0.20412415, %v3607_v60  ;;  %v2442_v60 = vld [vmem:[%s5508_s21 + $0x58] sm:$0xff] }
 0xaf6   : > { %v2285_v48 = vmul.f32 0.20412415, %v2276_v62  ;;  %v3951_v62 = vpack.c.bf16 %v2442_v60, %v2441_v59  ;;  %v2585_v59 = vld [vmem:[%s5513_s22 + $0x50] sm:$0xff]  ;;  %v2586_v60 = vld [vmem:[%s5513_s22 + $0x58] sm:$0xff] }
 0xaf7   : > { %v2288_v5 = vadd.f32 %v2286_v63, %v5682_v22  ;;  %v2443_v63 = vld [vmem:[%s5508_s21 + $0x60] sm:$0xff] }
 0xaf8   : > { %v2287_v12 = vadd.f32 %v2285_v48, %v5685_v25  ;;  %v2444_v48 = vld [vmem:[%s5508_s21 + $0x68] sm:$0xff] }
 0xaf9   : > { %v2292_v2 = vsel %vm1679_vm6, %v2288_v5, -inf }
 0xafa   : > { %v2289_v4 = vsel %vm1675_vm7, %v2287_v12, -inf }
 0xafb   : > { %2290 = vmax.xlane.f32.xlu0 %v2289_v4  ;;  %v2445_v4 = vld [vmem:[%s5508_s21 + $0x70] sm:$0xff] }
 0xaff   : > { %2293 = vmax.xlane.f32.xlu0 %v2292_v2 }
 0xb03   : > { %1891 = vadd.xlane.f32.xlu0 %v1890_v7 }
 0xb88   : > { %v2291_v8 = vpop.xlane.xlu0 %2290 }
 0xb89   : > { %v2295_v0 = vsub.f32 %v2287_v12, %v2291_v8  ;;  %v3955_v12 = vpack.c.bf16 %v2444_v48, %v2443_v63  ;;  %v2587_v63 = vld [vmem:[%s5513_s22 + $0x60] sm:$0xff]  ;;  %v2588_v48 = vld [vmem:[%s5513_s22 + $0x68] sm:$0xff] }
 0xb8b   : > { %v2297_v9 = vmul.f32 1.442695, %v2295_v0 }
 0xb8c   : > { %v2294_v10 = vpop.xlane.xlu0 %2293 }
 0xb8d   : > { %4300 = vpow2.f32 %v2297_v9  ;;  %v2296_v11 = vsub.f32 %v2288_v5, %v2294_v10  ;;  %v2446_v5 = vld [vmem:[%s5508_s21 + $0x78] sm:$0xff] }
 0xb8e   : > { %v3959_v2 = vpack.c.bf16 %v2446_v5, %v2445_v4  ;;  %v2589_v4 = vld [vmem:[%s5513_s22 + $0x70] sm:$0xff]  ;;  %v2590_v5 = vld [vmem:[%s5513_s22 + $0x78] sm:$0xff] }
 0xb8f   : > { %v2299_v15 = vmul.f32 1.442695, %v2296_v11 }
 0xb90   : > { %v1892_v25 = vpop.xlane.xlu0 %1891 }
 0xb91   : > { %4302 = vpow2.f32 %v2299_v15 }
 0xb92   : > { %4304 = vrcp.f32 %v1892_v25 }
 0xb93   : > { %4306 = vrcp.f32 %v1895_v17 }
 0xb97   : > { %v4301_v16 = vpop.eup %4300 }
 0xb98   : > { %v2301_v22 = vsel %vm1675_vm7, %v4301_v16, 0.0 }
 0xb99   : > { %2302 = vadd.xlane.f32.xlu0 %v2301_v22 }
 0xb9b   : > { %v4303_v21 = vpop.eup %4302 }
 0xb9c   : > { %v4305_v23 = vpop.eup %4304  ;;  %v2304_v24 = vsel %vm1679_vm6, %v4303_v21, 0.0 }
 0xb9d   : > { %2305 = vadd.xlane.f32.xlu1 %v2304_v24  ;;  %v1898_v26 = vmul.f32 %v4305_v23, %v4299_v6  ;;  %v4307_v31 = vpop.eup %4306 }
 0xb9e   : > { %v1899_v35 = vmul.f32 %v4307_v31, %v5741_v37  ;;  %v2431_v37 = vld [vmem:[%s5508_s21] sm:$0xff]  ;;  %s6051_s21 = scalar_lea.vmem [#allocation14], %s5440_s17 }
 0xb9f   : > { %3584 = vmatprep.mubr.msk.f32.mxu0 %vm1675_vm7, %v1898_v26  ;;  %v3931_v43 = vpack.c.bf16 %v2432_v41, %v2431_v37 }
 0xbae   : > { %4257 = vrot.lane.b32.xlu1 %v5667_v19, %s4846_s15 }
 0xbaf   : > { %4252 = vrot.lane.b32.xlu0 %v5667_v19, %s4845_s0 }
 0xc26   : > { %v2303_v1 = vpop.xlane.xlu0 %2302 }
 0xc27   : > { %4308 = vrcp.f32 %v2303_v1 }
 0xc2a   : > { %v2306_v27 = vpop.xlane.xlu1 %2305  ;;  %v4253_v20 = vpop.permute.xlu0 %4252 }
 0xc2b   : > { %4310 = vrcp.f32 %v2306_v27  ;;  %v4255_v28 = vunpack.i.h.bf16 %v4253_v20  ;;  %v4254_v29 = vunpack.i.l.bf16 %v4253_v20  ;;  %v3282_v20 = vld [vmem:[%s6051_s21] ss:$0 sm:$0xff] }
 0xc2d   : > { %v3901_v30 = vpack.c.bf16 %v4255_v28, %v4254_v29 }
 0xc2e   : > { %v4258_v32 = vpop.permute.xlu1 %4257 }
 0xc2f   : > { %v4260_v33 = vunpack.i.h.bf16 %v4258_v32  ;;  %v4259_v34 = vunpack.i.l.bf16 %v4258_v32  ;;  %3903 = vmatprep.subr.msk.bf16.mxu0 %vm5663_vm5, %v3901_v30 }
 0xc30   : > { %3906 = vmatpush3.bf16.msk.msra.mxu0 %vm5663_vm5, %v3901_v30 }
 0xc31   : > { %v4309_v19 = vpop.eup %4308  ;;  %v3925_v36 = vpack.c.bf16 %v4260_v33, %v4259_v34  ;;  %v2575_v33 = vld [vmem:[%s5513_s22] sm:$0xff]  ;;  %v2576_v34 = vld [vmem:[%s5513_s22 + $0x8] sm:$0xff] }
 0xc32   : > { %v2309_v38 = vmul.f32 %v4309_v19, %v4301_v16  ;;  %v2577_v19 = vld [vmem:[%s5513_s22 + $0x10] sm:$0xff] }
 0xc33   : > { %3585 = vmatmul.mubr.msk.f32.vlgmr.msra.gmra.mrb[4].mxu0 %vm1675_vm7, %v1899_v35  ;;  %3927 = vmatprep.subr.msk.bf16.mxu0 %vm5663_vm5, %v3925_v36  ;;  %v3963_v35 = vpack.c.bf16 %v2576_v34, %v2575_v33 }
 0xc34   : > { %3930 = vmatpush3.bf16.msk.msra.mxu0 %vm5663_vm5, %v3925_v36  ;;  %3612 = vmatprep.mubr.msk.f32.mxu0 %vm1675_vm7, %v2309_v38  ;;  %v2578_v36 = vld [vmem:[%s5513_s22 + $0x18] sm:$0xff] }
 0xc35   : > { %v4311_v39 = vpop.eup %4310  ;;  %3932 = vmatprep.subr.bf16.mxu0 %v3931_v43  ;;  %v3967_v38 = vpack.c.bf16 %v2578_v36, %v2577_v19  ;;  %3964 = vmatprep.subr.bf16.mxu1 %v3963_v35 }
 0xc36   : > { %v2310_v40 = vmul.f32 %v4311_v39, %v4303_v21  ;;  %3966 = vmatpush3.bf16.msra.mxu1 %v3963_v35  ;;  %v3284_v35 = vld [vmem:[%s6053_s5] ss:$0 sm:$0xff] }
 0xc37   : > { %3968 = vmatprep.subr.bf16.mxu1 %v3967_v38 }
 0xc38   : > { %3613 = vmatmul.mubr.msk.f32.vlgmr.msra.gmra.mrb[6].mxu0 %vm1675_vm7, %v2310_v40 }
 0xc39   : > { %3934 = vmatpush3.bf16.msra.mxu0 %v3931_v43 }
 0xc3a   : > { %3936 = vmatprep.subr.bf16.mxu0 %v3935_v46  ;;  %3970 = vmatpush3.bf16.msra.mxu1 %v3967_v38 }
 0xc3d   : > { %3938 = vmatpush3.bf16.msra.mxu0 %v3935_v46 }
 0xc3e   : > { %3940 = vmatprep.subr.bf16.mxu0 %v3939_v49 }
 0xc41   : > { %3942 = vmatpush3.bf16.msra.mxu0 %v3939_v49  ;;  %v2580_v49 = vld [vmem:[%s5513_s22 + $0x28] sm:$0xff]  ;;  %s6052_s22 = scalar_lea.vmem [#allocation16], %s5440_s17 }
 0xc42   : > { %3944 = vmatprep.subr.bf16.mxu0 %v3943_v52  ;;  %v3283_v34 = vld [vmem:[%s6052_s22] ss:$0 sm:$0xff] }
 0xc45   : > { %3946 = vmatpush3.bf16.msra.mxu0 %v3943_v52  ;;  %v3975_v52 = vpack.c.bf16 %v2582_v51, %v2581_v50 }
 0xc46   : > { %3948 = vmatprep.subr.bf16.mxu0 %v3947_v58 }
 0xc49   : > { %3950 = vmatpush3.bf16.msra.mxu0 %v3947_v58  ;;  %v3979_v58 = vpack.c.bf16 %v2584_v55, %v2583_v53 }
 0xc4a   : > { %3952 = vmatprep.subr.bf16.mxu0 %v3951_v62 }
 0xc4d   : > { %3954 = vmatpush3.bf16.msra.mxu0 %v3951_v62  ;;  %v3983_v62 = vpack.c.bf16 %v2586_v60, %v2585_v59 }
 0xc4e   : > { %3956 = vmatprep.subr.bf16.mxu0 %v3955_v12 }
 0xc51   : > { %3958 = vmatpush3.bf16.msra.mxu0 %v3955_v12  ;;  %v3987_v12 = vpack.c.bf16 %v2588_v48, %v2587_v63 }
 0xc52   : > { %3960 = vmatprep.subr.bf16.mxu0 %v3959_v2 }
 0xc55   : > { %3962 = vmatpush3.bf16.msra.mxu0 %v3959_v2  ;;  %v3991_v2 = vpack.c.bf16 %v2590_v5, %v2589_v4 }
 0xd06   : > { %v3586_v6 = vpop.f32.mrb[4].mxu0 }
 0xd07   : > { %v1980_v7 = vpop.f32.mrb[5].mxu0 }
 0xd08   : > { %v4261_v8 = vpack.i.bf16 %v3586_v6, %v1980_v7  ;;  %v2675_v6 = vld [vmem:[%s5471_s4] sm:$0xff]  ;;  %v2676_v7 = vld [vmem:[%s5471_s4 + $0x8] sm:$0xff] }
 0xd0a   : > { %4262 = vrot.lane.b32.xlu1 %v4261_v8, %s4846_s15  ;;  %v2677_v8 = vld [vmem:[%s5471_s4 + $0x10] sm:$0xff] }
 0xd0b   : > { %v3614_v0 = vpop.f32.mrb[6].mxu0 }
 0xd0c   : > { %v2390_v9 = vpop.f32.mrb[7].mxu0 }
 0xd0d   : > { %v4271_v10 = vpack.i.bf16 %v3614_v0, %v2390_v9  ;;  %v3995_v0 = vpack.c.bf16 %v2676_v7, %v2675_v6  ;;  %v2678_v9 = vld [vmem:[%s5471_s4 + $0x18] sm:$0xff] }
 0xd0e   : > { %4267 = vrot.lane.b32.xlu1 %v4266_v57, %s4844_s11 }
 0xd0f   : > { %4272 = vrot.lane.b32.xlu0 %v4271_v10, %s4845_s0  ;;  %v3999_v10 = vpack.c.bf16 %v2678_v9, %v2677_v8  ;;  %3996 = vmatprep.subr.bf16.mxu0 %v3995_v0 }
 0xd7c   : > { %v4263_v11 = vpop.permute.xlu1 %4262 }
 0xd7d   : > { %v4265_v15 = vunpack.i.h.bf16 %v4263_v11  ;;  %v4264_v25 = vunpack.i.l.bf16 %v4263_v11  ;;  %v2679_v11 = vld [vmem:[%s5471_s4 + $0x20] sm:$0xff] }
 0xd7f   : > { %v2424_v24 = vsel %vm1583_vm2, %v5719_v45, %v4265_v15  ;;  %v2423_v54 = vsel %vm1583_vm2, %v5721_v61, %v4264_v25  ;;  %v2680_v15 = vld [vmem:[%s5471_s4 + $0x28] sm:$0xff] }
 0xd80   : > { %v4268_v16 = vpop.permute.xlu1 %4267  ;;  %v4003_v25 = vpack.c.bf16 %v2680_v15, %v2679_v11 }
 0xd81   : > { %v4270_v22 = vunpack.i.h.bf16 %v4268_v16  ;;  %v4269_v21 = vunpack.i.l.bf16 %v4268_v16  ;;  %v4273_v23 = vpop.permute.xlu0 %4272  ;;  %v2681_v16 = vld [vmem:[%s5471_s4 + $0x30] sm:$0xff] }
 0xd82   : > { %v4275_v26 = vunpack.i.h.bf16 %v4273_v23  ;;  %v4274_v17 = vunpack.i.l.bf16 %v4273_v23  ;;  %v2683_v23 = vld [vmem:[%s5471_s4 + $0x40] sm:$0xff] }
 0xd83   : > { %v2426_v56 = vsel %vm2425_vm8, %v2423_v54, %v4269_v21  ;;  %v2427_v57 = vsel %vm2425_vm8, %v2424_v24, %v4270_v22  ;;  %v2682_v22 = vld [vmem:[%s5471_s4 + $0x38] sm:$0xff]  ;;  %v2684_v24 = vld [vmem:[%s5471_s4 + $0x48] sm:$0xff] }
 0xd84   : > { %v2429_v1 = vsel %vm2428_vm9, %v2426_v56, %v4274_v17  ;;  %v2430_v27 = vsel %vm2428_vm9, %v2427_v57, %v4275_v26  ;;  %v4007_v21 = vpack.c.bf16 %v2682_v22, %v2681_v16  ;;  %v4011_v26 = vpack.c.bf16 %v2684_v24, %v2683_v23  ;;  %v2685_v17 = vld [vmem:[%s5471_s4 + $0x50] sm:$0xff]  ;;  %v2686_v54 = vld [vmem:[%s5471_s4 + $0x58] sm:$0xff]  ;;  %v2687_v57 = vld [vmem:[%s5471_s4 + $0x60] sm:$0xff] }
 0xd85   : > { %3647 = vmatprep.mubr.f32.mxu0 %v2429_v1  ;;  %v4015_v56 = vpack.c.bf16 %v2686_v54, %v2685_v17  ;;  %v2688_v1 = vld [vmem:[%s5471_s4 + $0x68] sm:$0xff] }
 0xd86   : > { %3648 = vmatmul.mubr.f32.vlgmr.msra.gmra.mrb[8].mxu0 %v2430_v27  ;;  %v4019_v27 = vpack.c.bf16 %v2688_v1, %v2687_v57 }
 0xd87   : > { %3998 = vmatpush3.bf16.msra.mxu0 %v3995_v0 }
 0xd88   : > { %4000 = vmatprep.subr.bf16.mxu0 %v3999_v10 }
 0xd8b   : > { %4002 = vmatpush3.bf16.msra.mxu0 %v3999_v10 }
 0xd8c   : > { %4004 = vmatprep.subr.bf16.mxu0 %v4003_v25 }
 0xd8f   : > { %4006 = vmatpush3.bf16.msra.mxu0 %v4003_v25 }
 0xd90   : > { %4008 = vmatprep.subr.bf16.mxu0 %v4007_v21 }
 0xd93   : > { %4010 = vmatpush3.bf16.msra.mxu0 %v4007_v21 }
 0xd94   : > { %4012 = vmatprep.subr.bf16.mxu0 %v4011_v26 }
 0xd97   : > { %4014 = vmatpush3.bf16.msra.mxu0 %v4011_v26 }
 0xd98   : > { %4016 = vmatprep.subr.bf16.mxu0 %v4015_v56 }
 0xd9b   : > { %4018 = vmatpush3.bf16.msra.mxu0 %v4015_v56 }
 0xd9c   : > { %4020 = vmatprep.subr.bf16.mxu0 %v4019_v27 }
 0xd9f   : > { %4022 = vmatpush3.bf16.msra.mxu0 %v4019_v27 }
 0xe59   : > { %v3649_v28 = vpop.f32.mrb[8].mxu0 }
 0xe5a   : > { %v2526_v29 = vadd.f32 %v3649_v28, %v3282_v20  ;;  %v2520_v45 = vpop.f32.mrb[9].mxu0 }
 0xe5b   : > { %v2521_v30 = vadd.f32 %v3282_v20, %v2520_v45 }
 0xe5c   : > { %v5816_v31 = vadd.f32 %v2526_v29, %v5574_v14 }
 0xe5d   : > { %v5819_v61 = vadd.f32 %v2521_v30, %v5572_v13 }
 0xe5e   : > { %v2535_v32 = vsel %vm1323_vm1, %v5816_v31, 0.0 }
 0xe5f   : > { %2536 = vadd.xlane.f32.xlu0 %v2535_v32  ;;  %2533 = vadd.xlane.f32.xlu1 %v5819_v61 }
 0xeec   : > { %v2537_v13 = vpop.xlane.xlu0 %2536  ;;  %v2534_v14 = vpop.xlane.xlu1 %2533 }
 0xeed   : > { %v2539_v39 = vmul.f32 0.010416667, %v2537_v13  ;;  %v2538_v40 = vmul.f32 0.010416667, %v2534_v14 }
 0xeef   : > { %v2541_v37 = vsub.f32 %v5816_v31, %v2539_v39  ;;  %v2540_v41 = vsub.f32 %v5819_v61, %v2538_v40 }
 0xef1   : > { %v5831_v42 = vmul.f32 %v5498_v3, %v2541_v37  ;;  %v5834_v43 = vmul.f32 %v5498_v3, %v2540_v41  ;;  %v3971_v3 = vpack.c.bf16 %v2580_v49, %v2579_v18  ;;  %v2689_v37 = vld [vmem:[%s5471_s4 + $0x70] sm:$0xff]  ;;  %v2690_v41 = vld [vmem:[%s5471_s4 + $0x78] sm:$0xff]  ;;  %s6056_s4 = sld [smem:[#allocation35_spill]] }
 0xef3   : > { %v2544_v44 = vmul.f32 %v5834_v43, %v5834_v43  ;;  %v2545_v46 = vmul.f32 %v5831_v42, %v5831_v42  ;;  %3972 = vmatprep.subr.bf16.mxu1 %v3971_v3 }
 0xef4   : > { %3974 = vmatpush3.bf16.msra.mxu1 %v3971_v3 }
 0xef5   : > { %2546 = vadd.xlane.f32.xlu0 %v2544_v44  ;;  %v2548_v47 = vsel %vm1323_vm1, %v2545_v46, 0.0  ;;  %3976 = vmatprep.subr.bf16.mxu1 %v3975_v52  ;;  %v4023_v44 = vpack.c.bf16 %v2690_v41, %v2689_v37  ;;  %v3285_v46 = vld [vmem:[%s6054_s27] ss:$0 sm:$0xff] }
 0xef7   : > { %4024 = vmatprep.subr.bf16.mxu0 %v4023_v44  ;;  %p3287_p0 = scmp.ne.s32.totalorder %s6056_s4, 1 }
 0xef8   : > { %3978 = vmatpush3.bf16.msra.mxu1 %v3975_v52  ;;  %4026 = vmatpush3.bf16.msra.mxu0 %v4023_v44  ;;  %v2781_v60 = vld [vmem:[#allocation23] sm:$0xff] (!%p3287_p0)  ;;  %v2783_v63 = vld [vmem:[#allocation23 + $0x10] sm:$0xff] (!%p3287_p0)  ;;  %v2790_v0 = vld [vmem:[#allocation23 + $0x48] sm:$0xff] (!%p3287_p0) }
 0xef9   : > { %2549 = vadd.xlane.f32.xlu0 %v2548_v47  ;;  %3980 = vmatprep.subr.bf16.mxu1 %v3979_v58  ;;  %v2785_v5 = vld [vmem:[#allocation23 + $0x20] sm:$0xff] (!%p3287_p0)  ;;  %v2787_v6 = vld [vmem:[#allocation23 + $0x30] sm:$0xff] (!%p3287_p0)  ;;  %v2792_v11 = vld [vmem:[#allocation23 + $0x58] sm:$0xff] (!%p3287_p0) }
 0xefa   : > { %v2789_v8 = vld [vmem:[#allocation23 + $0x40] sm:$0xff] (!%p3287_p0)  ;;  %v2791_v10 = vld [vmem:[#allocation23 + $0x50] sm:$0xff] (!%p3287_p0)  ;;  %v2794_v16 = vld [vmem:[#allocation23 + $0x68] sm:$0xff] (!%p3287_p0) }
 0xefb   : > { %v4043_v9 = vpack.c.bf16 (!%p3287_p0), %v2790_v0, %v2789_v8  ;;  %v4047_v15 = vpack.c.bf16 (!%p3287_p0), %v2792_v11, %v2791_v10  ;;  %v2793_v25 = vld [vmem:[#allocation23 + $0x60] sm:$0xff] (!%p3287_p0)  ;;  %v2795_v21 = vld [vmem:[#allocation23 + $0x70] sm:$0xff] (!%p3287_p0)  ;;  %v2796_v23 = vld [vmem:[#allocation23 + $0x78] sm:$0xff] (!%p3287_p0) }
 0xefc   : > { %3982 = vmatpush3.bf16.msra.mxu1 %v3979_v58  ;;  %v4051_v22 = vpack.c.bf16 (!%p3287_p0), %v2794_v16, %v2793_v25  ;;  %v4055_v24 = vpack.c.bf16 (!%p3287_p0), %v2796_v23, %v2795_v21 }
 0xefd   : > { %3984 = vmatprep.subr.bf16.mxu1 %v3983_v62 }
 0xf00   : > { %3986 = vmatpush3.bf16.msra.mxu1 %v3983_v62  ;;  %v2782_v62 = vld [vmem:[#allocation23 + $0x8] sm:$0xff] (!%p3287_p0) }
 0xf01   : > { %3988 = vmatprep.subr.bf16.mxu1 %v3987_v12  ;;  %v4027_v48 = vpack.c.bf16 (!%p3287_p0), %v2782_v62, %v2781_v60 }
 0xf03   : > { %4028 = vmatprep.subr.bf16.mxu0 (!%p3287_p0), %v4027_v48 }
 0xf04   : > { %3990 = vmatpush3.bf16.msra.mxu1 %v3987_v12  ;;  %v2784_v12 = vld [vmem:[#allocation23 + $0x18] sm:$0xff] (!%p3287_p0) }
 0xf05   : > { %3992 = vmatprep.subr.bf16.mxu1 %v3991_v2  ;;  %v4031_v4 = vpack.c.bf16 (!%p3287_p0), %v2784_v12, %v2783_v63 }
 0xf08   : > { %3994 = vmatpush3.bf16.msra.mxu1 %v3991_v2  ;;  %v2786_v2 = vld [vmem:[#allocation23 + $0x28] sm:$0xff] (!%p3287_p0) }
 0xf82   : > { %v2547_v20 = vpop.xlane.xlu0 %2546 }
 0xf83   : > { %v2551_v28 = vmul.f32 0.010416667, %v2547_v20 }
 0xf85   : > { %v2553_v29 = vadd.f32 1e-05, %v2551_v28 }
 0xf86   : > { %v2550_v45 = vpop.xlane.xlu0 %2549 }
 0xf87   : > { %4312 = vrsqrt.f32 %v2553_v29  ;;  %v2552_v30 = vmul.f32 0.010416667, %v2550_v45 }
 0xf89   : > { %v2554_v32 = vadd.f32 1e-05, %v2552_v30 }
 0xf8b   : > { %4314 = vrsqrt.f32 %v2554_v32 }
 0xf91   : > { %v4313_v33 = vpop.eup %4312 }
 0xf92   : > { %v2557_v19 = vmul.f32 %v4313_v33, %v5834_v43 }
 0xf94   : > { %v2565_v36 = vmul.f32 %v3283_v34, %v2557_v19 }
 0xf95   : > { %v4315_v38 = vpop.eup %4314 }
 0xf96   : > { %v2558_v13 = vmul.f32 %v4315_v38, %v5831_v42  ;;  %v2573_v14 = vadd.f32 %v3284_v35, %v2565_v36  ;;  %v3286_v42 = vld [vmem:[%s6055_s26] ss:$0 sm:$0xff] }
 0xf98   : > { %v2566_v39 = vmul.f32 %v3283_v34, %v2558_v13  ;;  %3682 = vmatprep.mubr.f32.mxu1 %v2573_v14 }
 0xf9a   : > { %v2574_v40 = vadd.f32 %v3284_v35, %v2566_v39 }
 0xf9c   : > { %3683 = vmatmul.mubr.f32.vlgmr.msra.gmra.mrb[14].mxu1 %v2574_v40 }
0x106f   : > { %v3684_v43 = vpop.f32.mrb[14].mxu1 }
0x1070   : > { %v2670_v47 = vadd.f32 %v3684_v43, %v3285_v46  ;;  %v2664_v18 = vpop.f32.mrb[15].mxu1 }
0x1071   : > { %v2665_v49 = vadd.f32 %v3285_v46, %v2664_v18 }
0x1072   : > { %v2674_v50 = vmax.f32 %v2670_v47, 0.0 }
0x1073   : > { %v2673_v3 = vmax.f32 %v2665_v49, 0.0 }
0x1075   : > { %3717 = vmatprep.mubr.f32.mxu0 %v2673_v3 }
0x1076   : > { %3718 = vmatmul.mubr.f32.vlgmr.msra.gmra.mrb[10].mxu0 %v2674_v50 }
0x1077   : > { %4030 = vmatpush3.bf16.msra.mxu0 (!%p3287_p0), %v4027_v48 }
0x1078   : > { %4032 = vmatprep.subr.bf16.mxu0 (!%p3287_p0), %v4031_v4 }
0x107b   : > { %4034 = vmatpush3.bf16.msra.mxu0 (!%p3287_p0), %v4031_v4 }
0x1149   : > { %v3719_v51 = vpop.f32.mrb[10].mxu0  ;;  %2780 = sbr.rel (%p3287_p0) target bundleno = 4668 (0x123c), region = 164 }
0x114a   : > { %v2770_v52 = vadd.f32 %v3719_v51, %v3286_v42  ;;  %v2764_v53 = vpop.f32.mrb[11].mxu0 }
0x114b   : > { %v2765_v55 = vadd.f32 %v3286_v42, %v2764_v53 }
0x114c   : > { %v2774_v58 = vadd.f32 %v2770_v52, %v5816_v31  ;;  %v4035_v31 = vpack.c.bf16 (!%p3287_p0), %v2786_v2, %v2785_v5 }
0x114d   : > { %v2773_v59 = vadd.f32 %v2765_v55, %v5819_v61  ;;  %v2788_v61 = vld [vmem:[#allocation23 + $0x38] sm:$0xff] (!%p3287_p0) }
0x114e   : > { %2776 = vst [vmem:[#allocation2 + $0x8] sm:$0x1] %v2774_v58  ;;  %4036 = vmatprep.subr.bf16.mxu0 (!%p3287_p0), %v4035_v31  ;;  %v4039_v7 = vpack.c.bf16 (!%p3287_p0), %v2788_v61, %v2787_v6 }
0x114f   : > { %2775 = vst [vmem:[#allocation2] sm:$0xff] %v2773_v59  ;;  %3752 = vmatprep.mubr.f32.mxu0 (!%p3287_p0), %v2773_v59  ;;  %4038 = vmatpush3.bf16.msra.mxu0 (!%p3287_p0), %v4035_v31 }
0x1150   : > { %4040 = vmatprep.subr.bf16.mxu0 %v4039_v7 }
0x1153   : > { %4042 = vmatpush3.bf16.msra.mxu0 %v4039_v7 }
0x1154   : > { %4044 = vmatprep.subr.bf16.mxu0 %v4043_v9 }
0x1157   : > { %4046 = vmatpush3.bf16.msra.mxu0 %v4043_v9 }
0x1158   : > { %4048 = vmatprep.subr.bf16.mxu0 %v4047_v15 }
0x115b   : > { %4050 = vmatpush3.bf16.msra.mxu0 %v4047_v15 }
0x115c   : > { %4052 = vmatprep.subr.bf16.mxu0 %v4051_v22 }
0x115f   : > { %4054 = vmatpush3.bf16.msra.mxu0 %v4051_v22 }
0x1160   : > { %4056 = vmatprep.subr.bf16.mxu0 %v4055_v24 }
0x1163   : > { %4058 = vmatpush3.bf16.msra.mxu0 %v4055_v24 }
0x1166   : > { %3753 = vmatmul.mubr.f32.vlgmr.msra.gmra.mrb[0].mxu0 %v2774_v58 }
0x1239   : > { %v3754_v26 = vpop.f32.mrb[0].mxu0 }
0x123a   : > { %2873 = vst [vmem:[%s5503_s29 + $0x8] sm:$0x1] %v3754_v26  ;;  %v2863_v17 = vpop.f32.mrb[1].mxu0 }
0x123b   : > { %2872 = vst [vmem:[%s5503_s29] sm:$0xff] %v2863_v17 }
0x123c PF: > { %s6057_s17 = sld [smem:[#allocation38_spill]]  ;;  %s6058_s1 = sld [smem:[#allocation33_spill]] }
0x123d   : > { %s6059_s22 = sld [smem:[#allocation34_spill]]  ;;  %s6060_s23 = sld [smem:[#allocation44_spill]] }
0x123e   : > { %s6061_s2 = sld [smem:[#allocation37_spill]]  ;;  %s6062_s20 = sld [smem:[#allocation42_spill]] }
0x123f   : > { %s6063_s3 = sld [smem:[#allocation43_spill]]  ;;  %s6064_s24 = smov %s4814_s25 }
0x1242   : > { %s48_s26 = sadd.s32 1, %s6057_s17  }
0x1243   : > { %p45_p11 = scmp.ge.s32.totalorder %s48_s26, 6  }
0x1244   : > { %s6065_s25 = smov %s6062_s20 }
0x1245   :  { %47 = sbr.rel (!%p45_p11) target bundleno = 32 (0x20), region = 284 }
0x124c   :  { %2895 = vsyncpa [#allocation4], 1 }
0x124d   :  { %2897 = vsyncpa [#allocation4 + $0x1], 1 }
0x124e   :  { %2898 = vsyncpa [#allocation6], 1 }
0x124f   :  { %2899 = vsyncpa [#allocation9], 1 }
0x1250   :  { %2901 = vsyncpa [#allocation9 + $0x1], 1 }
0x1251   :  { %2902 = vsyncpa [#allocation12], 1 }
0x1252   :  { %2904 = vsyncpa [#allocation12 + $0x1], 1 }
0x1253   :  { %2905 = vsyncpa [#allocation15], 1 }
0x1254   :  { %2907 = vsyncpa [#allocation15 + $0x1], 1 }
0x1255   :  { %2908 = vsyncpa [#allocation18], 1 }
0x1256   :  { %2910 = vsyncpa [#allocation18 + $0x1], 1 }
0x1257   :  { %2911 = vsyncpa [#allocation21], 1 }
0x1258   :  { %2913 = vsyncpa [#allocation21 + $0x1], 1 }
0x1259   :  { %2914 = vsyncpa [#allocation24], 1 }

</bundles_post_ra>
